<compile_context>
chip_gen: v7x
topology: tpu7x:2x2x1
jax: 0.10.0
libtpu: 0.0.40
codegen_flags: <defaults>
</compile_context>

<pallas_src>
import math

import jax
import jax.numpy as jnp
from jax.experimental import pallas as pl
from jax.experimental.pallas import tpu as pltpu


_EPS = 1e-7  # same eps as ultralytics bbox_iou


def _recip(x):
    """1/x: EUP approx reciprocal seed + one Newton-Raphson step (~f32 accurate)."""
    r = pl.reciprocal(x, approx=True)
    return r * (2.0 - x * r)


def _atan(x):
    """Elementwise arctan (Cephes atanf), ~1e-7 abs error, Mosaic-safe ops only."""
    sign = jnp.where(x < 0.0, -1.0, 1.0)
    ax = jnp.abs(x)
    big = ax > 2.414213562373095                              # tan(3*pi/8)
    mid = (ax > 0.4142135623730950) & jnp.logical_not(big)    # tan(pi/8)
    x_big = -_recip(jnp.maximum(ax, 1.0))                     # max() guards unselected lanes
    x_mid = (ax - 1.0) * _recip(ax + 1.0)
    xr = jnp.where(big, x_big, jnp.where(mid, x_mid, ax))
    y0 = jnp.where(big, math.pi / 2, jnp.where(mid, math.pi / 4, 0.0))
    z = xr * xr
    p = ((8.05374449538e-2 * z - 1.38776856032e-1) * z + 1.99777106478e-1) * z - 3.33329491539e-1
    return sign * (y0 + xr + xr * z * p)


def _sum_all(v):
    """(tr, 128) -> (1, 1): lane reduce then sublane reduce (stays >= 2-D)."""
    return jnp.sum(jnp.sum(v, axis=-1, keepdims=True), axis=-2, keepdims=True)


def _bbox_loss_kernel(slab_ref, dist_ref, iou_ref, dfl_ref):
    # slab channels (each read is a dense (tr, 128) tile):
    #   0-3 pred box (x1,y1,x2,y2), 4-7 target box (x1,y1,x2,y2),
    #   8-9 anchor (x,y), 10 fgw = target_scores.sum(-1) * fg_mask.
    b1x1, b1y1, b1x2, b1y2 = slab_ref[0], slab_ref[1], slab_ref[2], slab_ref[3]
    b2x1, b2y1, b2x2, b2y2 = slab_ref[4], slab_ref[5], slab_ref[6], slab_ref[7]
    ax, ay = slab_ref[8], slab_ref[9]
    fgw = slab_ref[10]

    reg_max = dist_ref.shape[1]

    # ---------------- CIoU == bbox_iou(pred, target, xywh=False, CIoU=True) ----
    w1 = b1x2 - b1x1
    h1 = b1y2 - b1y1 + _EPS
    w2 = b2x2 - b2x1
    h2 = b2y2 - b2y1 + _EPS
    inter = (jnp.maximum(jnp.minimum(b1x2, b2x2) - jnp.maximum(b1x1, b2x1), 0.0) *
             jnp.maximum(jnp.minimum(b1y2, b2y2) - jnp.maximum(b1y1, b2y1), 0.0))
    union = w1 * h1 + w2 * h2 - inter + _EPS
    iou = inter * _recip(union)
    cw = jnp.maximum(b1x2, b2x2) - jnp.minimum(b1x1, b2x1)
    ch = jnp.maximum(b1y2, b2y2) - jnp.minimum(b1y1, b2y1)
    c2 = cw * cw + ch * ch + _EPS
    dx = b2x1 + b2x2 - b1x1 - b1x2
    dy = b2y1 + b2y2 - b1y1 - b1y2
    rho2 = (dx * dx + dy * dy) * 0.25
    dat = _atan(w2 * _recip(h2)) - _atan(w1 * _recip(h1))
    v = (4.0 / (math.pi ** 2)) * dat * dat
    alpha = v * _recip(v - iou + (1.0 + _EPS))
    ciou = iou - (rho2 * _recip(c2) + v * alpha)

    iou_part = _sum_all((1.0 - ciou) * fgw)               # raw (un-normalized) partial

    # ---------------- DFL: bbox2dist + weighted cross-entropy over reg_max bins -
    # TODO(synk): optional v7x win — scalar-prefetch a per-tile fg count and skip
    # this whole section with pl.when(count > 0) when the tile has no foreground.
    tmax = reg_max - 1 - 0.01                              # 14.99 for reg_max=16
    targets = (jnp.clip(ax - b2x1, 0.0, tmax),             # left
               jnp.clip(ay - b2y1, 0.0, tmax),             # top
               jnp.clip(b2x2 - ax, 0.0, tmax),             # right
               jnp.clip(b2y2 - ay, 0.0, tmax))             # bottom

    # float bin index, hoisted out of the 4-side loop: (reg_max, tr, 128)
    bins_f = jax.lax.broadcasted_iota(
        jnp.int32, (reg_max,) + fgw.shape, 0).astype(jnp.float32)

    ce_sum = None
    for s in range(4):                                     # static unroll over the 4 sides
        xs = dist_ref[s].astype(jnp.float32)               # (reg_max, tr, 128)
        tgt = targets[s]                                    # (tr, 128)
        # stable logsumexp over the bins (major axis -> pure per-tile VPU ops)
        m = jnp.max(xs, axis=0)
        lse = m + jnp.log(jnp.sum(jnp.exp(xs - m[None]), axis=0))
        # triangle weight == wl * onehot(tl) + wr * onehot(tl+1)  (exactly equal)
        sel = jnp.maximum(1.0 - jnp.abs(tgt[None] - bins_f), 0.0)
        picked = jnp.sum(xs * sel, axis=0)
        ce = lse - picked                                   # == wl*CE(x,tl) + wr*CE(x,tr)
        ce_sum = ce if ce_sum is None else ce_sum + ce

    dfl_part = _sum_all((ce_sum * 0.25) * fgw)             # mean over 4 sides, masked

    # per-tile partials; summed (and divided by target_scores_sum) in the wrapper
    iou_ref[...] = iou_part.reshape(1, 1, 1)
    dfl_ref[...] = dfl_part.reshape(1, 1, 1)


def _round_up(x, m):
    return ((x + m - 1) // m) * m


def bbox_loss(pred_dist, pred_bboxes, anchor_points, target_bboxes,
              target_scores, target_scores_sum, fg_mask, reg_max=16, tile_n=16384):
    """Pallas forward of ultralytics BboxLoss. Returns (loss_iou, loss_dfl)."""
    # TODO(synk): reg_max == 1 (DFL disabled) branch not implemented; module default is 16.
    assert reg_max > 1, "DFL branch assumes reg_max > 1"
    B, A, _ = pred_bboxes.shape
    N = B * A

    pb = pred_bboxes.reshape(N, 4).astype(jnp.float32)
    tb = target_bboxes.reshape(N, 4).astype(jnp.float32)
    anc = jnp.broadcast_to(anchor_points[None, :, :], (B, A, 2)).reshape(N, 2).astype(jnp.float32)
    # weight * fg pre-multiplied here: one slab row instead of two, one less multiply
    # per anchor in the kernel; non-fg / padded lanes contribute exactly 0.
    fgw = (target_scores.astype(jnp.float32).sum(-1) *
           fg_mask.astype(jnp.float32)).reshape(1, N)

    # One lane-dense slab for the 11 small per-anchor channels.
    slab = jnp.concatenate([pb.T, tb.T, anc.T, fgw], axis=0)                 # (11, N)
    # pred_dist -> (4, reg_max, N) in its original dtype (cast to f32 in-kernel).
    # TODO(synk): in a full training graph have the detection head emit this layout
    # (or let XLA fuse the transpose into the producer) so the dominant tensor is not
    # copied through HBM an extra time before the kernel reads it.
    pdist = pred_dist.reshape(N, 4, reg_max).transpose(1, 2, 0)              # (4, reg_max, N)

    # Tile the anchor axis in multiples of 1024 (=> tr multiple of 8 sublane rows);
    # pad with zeros: fgw = 0 there and every denominator carries +eps -> contributes 0.
    tn = min(_round_up(N, 1024), _round_up(tile_n, 1024))
    npad = _round_up(N, tn)
    if npad != N:
        slab = jnp.pad(slab, ((0, 0), (0, npad - N)))
        pdist = jnp.pad(pdist, ((0, 0), (0, 0), (0, npad - N)))
    num_tiles = npad // tn
    rows = npad // 128
    tr = tn // 128

    slab = slab.reshape(11, rows, 128)                     # dense (8,128)-tileable
    pdist = pdist.reshape(4, reg_max, rows, 128)

    iou_parts, dfl_parts = pl.pallas_call(
        _bbox_loss_kernel,
        out_shape=(jax.ShapeDtypeStruct((num_tiles, 1, 1), jnp.float32),
                   jax.ShapeDtypeStruct((num_tiles, 1, 1), jnp.float32)),
        grid=(num_tiles,),
        in_specs=[pl.BlockSpec((11, tr, 128), lambda i: (0, i, 0)),
                  pl.BlockSpec((4, reg_max, tr, 128), lambda i: (0, 0, i, 0))],
        out_specs=(pl.BlockSpec((1, 1, 1), lambda i: (i, 0, 0)),
                   pl.BlockSpec((1, 1, 1), lambda i: (i, 0, 0))),
        compiler_params=pltpu.CompilerParams(
            dimension_semantics=("parallel",),             # independent tiles (megacore on v7x)
            vmem_limit_bytes=48 * 1024 * 1024),
    )(slab, pdist)

    tss = jnp.asarray(target_scores_sum, jnp.float32)
    return jnp.sum(iou_parts) / tss, jnp.sum(dfl_parts) / tss


# ----------------------------- pure-JAX reference (mirrors the torch code) ------
def _bbox_iou_ciou_ref(box1, box2, eps=1e-7):
    b1_x1, b1_y1, b1_x2, b1_y2 = jnp.split(box1, 4, axis=-1)
    b2_x1, b2_y1, b2_x2, b2_y2 = jnp.split(box2, 4, axis=-1)
    w1, h1 = b1_x2 - b1_x1, b1_y2 - b1_y1 + eps
    w2, h2 = b2_x2 - b2_x1, b2_y2 - b2_y1 + eps
    inter = (jnp.clip(jnp.minimum(b1_x2, b2_x2) - jnp.maximum(b1_x1, b2_x1), 0, None) *
             jnp.clip(jnp.minimum(b1_y2, b2_y2) - jnp.maximum(b1_y1, b2_y1), 0, None))
    union = w1 * h1 + w2 * h2 - inter + eps
    iou = inter / union
    cw = jnp.maximum(b1_x2, b2_x2) - jnp.minimum(b1_x1, b2_x1)
    ch = jnp.maximum(b1_y2, b2_y2) - jnp.minimum(b1_y1, b2_y1)
    c2 = cw ** 2 + ch ** 2 + eps
    rho2 = ((b2_x1 + b2_x2 - b1_x1 - b1_x2) ** 2 + (b2_y1 + b2_y2 - b1_y1 - b1_y2) ** 2) / 4
    v = (4 / math.pi ** 2) * (jnp.arctan(w2 / h2) - jnp.arctan(w1 / h1)) ** 2
    alpha = v / (v - iou + (1 + eps))
    return iou - (rho2 / c2 + v * alpha)


def _bbox2dist_ref(anchor_points, bbox, reg_max):
    x1y1, x2y2 = jnp.split(bbox, 2, axis=-1)
    return jnp.clip(jnp.concatenate([anchor_points - x1y1, x2y2 - anchor_points], -1),
                    0, reg_max - 0.01)


def _dfl_loss_ref(pred_dist, target, reg_max=16):
    target = jnp.clip(target, 0, reg_max - 1 - 0.01)
    tl = target.astype(jnp.int32)
    tr = tl + 1
    wl = tr.astype(jnp.float32) - target
    wr = 1 - wl
    logp = jax.nn.log_softmax(pred_dist.astype(jnp.float32), axis=-1)
    ce_l = -jnp.take_along_axis(logp, tl.reshape(-1, 1), axis=-1).reshape(tl.shape)
    ce_r = -jnp.take_along_axis(logp, tr.reshape(-1, 1), axis=-1).reshape(tl.shape)
    return (ce_l * wl + ce_r * wr).mean(-1, keepdims=True)


def bbox_loss_ref(pred_dist, pred_bboxes, anchor_points, target_bboxes,
                  target_scores, target_scores_sum, fg_mask, reg_max=16):
    weight = target_scores.sum(-1)[fg_mask][:, None]
    iou = _bbox_iou_ciou_ref(pred_bboxes[fg_mask], target_bboxes[fg_mask])
    loss_iou = ((1.0 - iou) * weight).sum() / target_scores_sum
    target_ltrb = _bbox2dist_ref(anchor_points, target_bboxes, reg_max - 1)
    loss_dfl = (_dfl_loss_ref(pred_dist[fg_mask].reshape(-1, reg_max),
                              target_ltrb[fg_mask], reg_max) * weight).sum() / target_scores_sum
    return loss_iou, loss_dfl


if __name__ == "__main__":
    B, nc, reg_max = 2, 4, 16
    H = W = 8
    A = H * W                                   # 64 anchors per image

    key = jax.random.PRNGKey(0)
    k1, k2, k3, k4, k5 = jax.random.split(key, 5)

    # anchor grid points (stride-1 units), as make_anchors would produce
    xv, yv = jnp.meshgrid(jnp.arange(W, dtype=jnp.float32) + 0.5,
                          jnp.arange(H, dtype=jnp.float32) + 0.5)
    anchor_points = jnp.stack([xv.reshape(-1), yv.reshape(-1)], axis=-1)     # (A, 2)

    pred_dist = jax.random.normal(k1, (B, A, 4 * reg_max), dtype=jnp.float32)

    def make_boxes(k):
        off = jnp.abs(jax.random.normal(k, (B, A, 4), dtype=jnp.float32)) * 3.0 + 0.5
        axp, ayp = anchor_points[:, 0], anchor_points[:, 1]
        return jnp.stack([axp - off[..., 0], ayp - off[..., 1],
                          axp + off[..., 2], ayp + off[..., 3]], axis=-1)    # xyxy

    pred_bboxes = make_boxes(k2)
    target_bboxes = make_boxes(k3)
    target_scores = jax.random.uniform(k4, (B, A, nc), dtype=jnp.float32)
    fg_mask = jax.random.uniform(k5, (B, A)) > 0.4
    fg_mask = fg_mask.at[0, 0].set(True)        # ensure at least one foreground anchor
    target_scores_sum = jnp.maximum(target_scores.sum(), 1.0)

    loss_iou, loss_dfl = bbox_loss(pred_dist, pred_bboxes, anchor_points, target_bboxes,
                                   target_scores, target_scores_sum, fg_mask, reg_max=reg_max)
    loss_iou, loss_dfl = jax.block_until_ready((loss_iou, loss_dfl))

    ref_iou, ref_dfl = bbox_loss_ref(pred_dist, pred_bboxes, anchor_points, target_bboxes,
                                     target_scores, target_scores_sum, fg_mask, reg_max=reg_max)
    # Tolerance leaves headroom for the EUP approx-reciprocal seed (+1 Newton step)
    # and the Cephes atan; typical observed error is ~1e-6 relative.
    assert jnp.allclose(loss_iou, ref_iou, rtol=1e-4, atol=1e-5), (loss_iou, ref_iou)
    assert jnp.allclose(loss_dfl, ref_dfl, rtol=1e-4, atol=1e-5), (loss_dfl, ref_dfl)

    print("KERNEL_OK")
</pallas_src>

<mosaic_0001>
module attributes {stable_mosaic.version = 11 : i64} {
  func.func @_bbox_loss_kernel(%arg0: i32, %arg1: memref<11x8x128xf32, #tpu.memory_space<vmem>>, %arg2: memref<4x16x8x128xf32, #tpu.memory_space<vmem>>, %arg3: memref<1x1x1xf32, #tpu.memory_space<vmem>>, %arg4: memref<1x1x1xf32, #tpu.memory_space<vmem>>) attributes {dimension_semantics = [#tpu.dimension_semantics<parallel>], iteration_bounds = array<i64: 1>, scalar_prefetch = 0 : i64, scratch_operands = 0 : i64, tpu.core_type = #tpu.core_type<tc>, window_params = [{transform_indices = @transform_0, window_bounds = array<i64: 11, 8, 128>}, {transform_indices = @transform_1, window_bounds = array<i64: 4, 16, 8, 128>}, {transform_indices = @transform_2, window_bounds = array<i64: 1, 1, 1>}, {transform_indices = @transform_3, window_bounds = array<i64: 1, 1, 1>}]} {
    %c0 = arith.constant 0 : index
    %c0_0 = arith.constant 0 : index
    %c0_1 = arith.constant 0 : index
    %0 = vector.load %arg1[%c0, %c0_0, %c0_1] : memref<11x8x128xf32, #tpu.memory_space<vmem>>, vector<1x8x128xf32>
    %1 = vector.shape_cast %0 : vector<1x8x128xf32> to vector<8x128xf32>
    %c1 = arith.constant 1 : index
    %c0_2 = arith.constant 0 : index
    %c0_3 = arith.constant 0 : index
    %2 = vector.load %arg1[%c1, %c0_2, %c0_3] : memref<11x8x128xf32, #tpu.memory_space<vmem>>, vector<1x8x128xf32>
    %3 = vector.shape_cast %2 : vector<1x8x128xf32> to vector<8x128xf32>
    %c2 = arith.constant 2 : index
    %c0_4 = arith.constant 0 : index
    %c0_5 = arith.constant 0 : index
    %4 = vector.load %arg1[%c2, %c0_4, %c0_5] : memref<11x8x128xf32, #tpu.memory_space<vmem>>, vector<1x8x128xf32>
    %5 = vector.shape_cast %4 : vector<1x8x128xf32> to vector<8x128xf32>
    %c3 = arith.constant 3 : index
    %c0_6 = arith.constant 0 : index
    %c0_7 = arith.constant 0 : index
    %6 = vector.load %arg1[%c3, %c0_6, %c0_7] : memref<11x8x128xf32, #tpu.memory_space<vmem>>, vector<1x8x128xf32>
    %7 = vector.shape_cast %6 : vector<1x8x128xf32> to vector<8x128xf32>
    %c4 = arith.constant 4 : index
    %c0_8 = arith.constant 0 : index
    %c0_9 = arith.constant 0 : index
    %8 = vector.load %arg1[%c4, %c0_8, %c0_9] : memref<11x8x128xf32, #tpu.memory_space<vmem>>, vector<1x8x128xf32>
    %9 = vector.shape_cast %8 : vector<1x8x128xf32> to vector<8x128xf32>
    %c5 = arith.constant 5 : index
    %c0_10 = arith.constant 0 : index
    %c0_11 = arith.constant 0 : index
    %10 = vector.load %arg1[%c5, %c0_10, %c0_11] : memref<11x8x128xf32, #tpu.memory_space<vmem>>, vector<1x8x128xf32>
    %11 = vector.shape_cast %10 : vector<1x8x128xf32> to vector<8x128xf32>
    %c6 = arith.constant 6 : index
    %c0_12 = arith.constant 0 : index
    %c0_13 = arith.constant 0 : index
    %12 = vector.load %arg1[%c6, %c0_12, %c0_13] : memref<11x8x128xf32, #tpu.memory_space<vmem>>, vector<1x8x128xf32>
    %13 = vector.shape_cast %12 : vector<1x8x128xf32> to vector<8x128xf32>
    %c7 = arith.constant 7 : index
    %c0_14 = arith.constant 0 : index
    %c0_15 = arith.constant 0 : index
    %14 = vector.load %arg1[%c7, %c0_14, %c0_15] : memref<11x8x128xf32, #tpu.memory_space<vmem>>, vector<1x8x128xf32>
    %15 = vector.shape_cast %14 : vector<1x8x128xf32> to vector<8x128xf32>
    %c8 = arith.constant 8 : index
    %c0_16 = arith.constant 0 : index
    %c0_17 = arith.constant 0 : index
    %16 = vector.load %arg1[%c8, %c0_16, %c0_17] : memref<11x8x128xf32, #tpu.memory_space<vmem>>, vector<1x8x128xf32>
    %17 = vector.shape_cast %16 : vector<1x8x128xf32> to vector<8x128xf32>
    %c9 = arith.constant 9 : index
    %c0_18 = arith.constant 0 : index
    %c0_19 = arith.constant 0 : index
    %18 = vector.load %arg1[%c9, %c0_18, %c0_19] : memref<11x8x128xf32, #tpu.memory_space<vmem>>, vector<1x8x128xf32>
    %19 = vector.shape_cast %18 : vector<1x8x128xf32> to vector<8x128xf32>
    %c10 = arith.constant 10 : index
    %c0_20 = arith.constant 0 : index
    %c0_21 = arith.constant 0 : index
    %20 = vector.load %arg1[%c10, %c0_20, %c0_21] : memref<11x8x128xf32, #tpu.memory_space<vmem>>, vector<1x8x128xf32>
    %21 = vector.shape_cast %20 : vector<1x8x128xf32> to vector<8x128xf32>
    %22 = arith.subf %5, %1 : vector<8x128xf32>
    %23 = arith.subf %7, %3 : vector<8x128xf32>
    %cst = arith.constant 1.000000e-07 : f32
    %24 = vector.broadcast %cst : f32 to vector<8x128xf32>
    %25 = arith.addf %23, %24 : vector<8x128xf32>
    %26 = arith.subf %13, %9 : vector<8x128xf32>
    %27 = arith.subf %15, %11 : vector<8x128xf32>
    %cst_22 = arith.constant 1.000000e-07 : f32
    %28 = vector.broadcast %cst_22 : f32 to vector<8x128xf32>
    %29 = arith.addf %27, %28 : vector<8x128xf32>
    %30 = arith.minimumf %5, %13 : vector<8x128xf32>
    %31 = arith.maximumf %1, %9 : vector<8x128xf32>
    %32 = arith.subf %30, %31 : vector<8x128xf32>
    %cst_23 = arith.constant 0.000000e+00 : f32
    %33 = vector.broadcast %cst_23 : f32 to vector<8x128xf32>
    %34 = arith.maximumf %32, %33 : vector<8x128xf32>
    %35 = arith.minimumf %7, %15 : vector<8x128xf32>
    %36 = arith.maximumf %3, %11 : vector<8x128xf32>
    %37 = arith.subf %35, %36 : vector<8x128xf32>
    %cst_24 = arith.constant 0.000000e+00 : f32
    %38 = vector.broadcast %cst_24 : f32 to vector<8x128xf32>
    %39 = arith.maximumf %37, %38 : vector<8x128xf32>
    %40 = arith.mulf %34, %39 : vector<8x128xf32>
    %41 = arith.mulf %22, %25 : vector<8x128xf32>
    %42 = arith.mulf %26, %29 : vector<8x128xf32>
    %43 = arith.addf %41, %42 : vector<8x128xf32>
    %44 = arith.subf %43, %40 : vector<8x128xf32>
    %cst_25 = arith.constant 1.000000e-07 : f32
    %45 = vector.broadcast %cst_25 : f32 to vector<8x128xf32>
    %46 = arith.addf %44, %45 : vector<8x128xf32>
    %47 = tpu.reciprocal %46 {approx = true} : vector<8x128xf32> -> vector<8x128xf32>
    %48 = arith.mulf %46, %47 : vector<8x128xf32>
    %cst_26 = arith.constant 2.000000e+00 : f32
    %49 = vector.broadcast %cst_26 : f32 to vector<8x128xf32>
    %50 = arith.subf %49, %48 : vector<8x128xf32>
    %51 = arith.mulf %47, %50 : vector<8x128xf32>
    %52 = arith.mulf %40, %51 : vector<8x128xf32>
    %53 = arith.maximumf %5, %13 : vector<8x128xf32>
    %54 = arith.minimumf %1, %9 : vector<8x128xf32>
    %55 = arith.subf %53, %54 : vector<8x128xf32>
    %56 = arith.maximumf %7, %15 : vector<8x128xf32>
    %57 = arith.minimumf %3, %11 : vector<8x128xf32>
    %58 = arith.subf %56, %57 : vector<8x128xf32>
    %59 = arith.mulf %55, %55 : vector<8x128xf32>
    %60 = arith.mulf %58, %58 : vector<8x128xf32>
    %61 = arith.addf %59, %60 : vector<8x128xf32>
    %cst_27 = arith.constant 1.000000e-07 : f32
    %62 = vector.broadcast %cst_27 : f32 to vector<8x128xf32>
    %63 = arith.addf %61, %62 : vector<8x128xf32>
    %64 = arith.addf %9, %13 : vector<8x128xf32>
    %65 = arith.subf %64, %1 : vector<8x128xf32>
    %66 = arith.subf %65, %5 : vector<8x128xf32>
    %67 = arith.addf %11, %15 : vector<8x128xf32>
    %68 = arith.subf %67, %3 : vector<8x128xf32>
    %69 = arith.subf %68, %7 : vector<8x128xf32>
    %70 = arith.mulf %66, %66 : vector<8x128xf32>
    %71 = arith.mulf %69, %69 : vector<8x128xf32>
    %72 = arith.addf %70, %71 : vector<8x128xf32>
    %cst_28 = arith.constant 2.500000e-01 : f32
    %73 = vector.broadcast %cst_28 : f32 to vector<8x128xf32>
    %74 = arith.mulf %72, %73 : vector<8x128xf32>
    %75 = tpu.reciprocal %29 {approx = true} : vector<8x128xf32> -> vector<8x128xf32>
    %76 = arith.mulf %29, %75 : vector<8x128xf32>
    %cst_29 = arith.constant 2.000000e+00 : f32
    %77 = vector.broadcast %cst_29 : f32 to vector<8x128xf32>
    %78 = arith.subf %77, %76 : vector<8x128xf32>
    %79 = arith.mulf %75, %78 : vector<8x128xf32>
    %80 = arith.mulf %26, %79 : vector<8x128xf32>
    %cst_30 = arith.constant 0.000000e+00 : f32
    %81 = vector.broadcast %cst_30 : f32 to vector<8x128xf32>
    %82 = arith.cmpf olt, %80, %81 : vector<8x128xf32>
    %cst_31 = arith.constant -1.000000e+00 : f32
    %cst_32 = arith.constant 1.000000e+00 : f32
    %83 = vector.broadcast %cst_31 : f32 to vector<8x128xf32>
    %84 = vector.broadcast %cst_32 : f32 to vector<8x128xf32>
    %85 = arith.select %82, %83, %84 : vector<8x128xi1>, vector<8x128xf32>
    %86 = math.absf %80 : vector<8x128xf32>
    %cst_33 = arith.constant 2.41421366 : f32
    %87 = vector.broadcast %cst_33 : f32 to vector<8x128xf32>
    %88 = arith.cmpf ogt, %86, %87 : vector<8x128xf32>
    %cst_34 = arith.constant 0.414213568 : f32
    %89 = vector.broadcast %cst_34 : f32 to vector<8x128xf32>
    %90 = arith.cmpf ogt, %86, %89 : vector<8x128xf32>
    %cst_35 = arith.constant dense<true> : vector<8x128xi1>
    %91 = arith.xori %88, %cst_35 : vector<8x128xi1>
    %92 = arith.andi %90, %91 : vector<8x128xi1>
    %cst_36 = arith.constant 1.000000e+00 : f32
    %93 = vector.broadcast %cst_36 : f32 to vector<8x128xf32>
    %94 = arith.maximumf %86, %93 : vector<8x128xf32>
    %95 = tpu.reciprocal %94 {approx = true} : vector<8x128xf32> -> vector<8x128xf32>
    %96 = arith.mulf %94, %95 : vector<8x128xf32>
    %cst_37 = arith.constant 2.000000e+00 : f32
    %97 = vector.broadcast %cst_37 : f32 to vector<8x128xf32>
    %98 = arith.subf %97, %96 : vector<8x128xf32>
    %99 = arith.mulf %95, %98 : vector<8x128xf32>
    %cst_38 = arith.constant 0.000000e+00 : f32
    %100 = vector.broadcast %cst_38 : f32 to vector<8x128xf32>
    %101 = arith.subf %100, %99 : vector<8x128xf32>
    %cst_39 = arith.constant 1.000000e+00 : f32
    %102 = vector.broadcast %cst_39 : f32 to vector<8x128xf32>
    %103 = arith.subf %86, %102 : vector<8x128xf32>
    %cst_40 = arith.constant 1.000000e+00 : f32
    %104 = vector.broadcast %cst_40 : f32 to vector<8x128xf32>
    %105 = arith.addf %86, %104 : vector<8x128xf32>
    %106 = tpu.reciprocal %105 {approx = true} : vector<8x128xf32> -> vector<8x128xf32>
    %107 = arith.mulf %105, %106 : vector<8x128xf32>
    %cst_41 = arith.constant 2.000000e+00 : f32
    %108 = vector.broadcast %cst_41 : f32 to vector<8x128xf32>
    %109 = arith.subf %108, %107 : vector<8x128xf32>
    %110 = arith.mulf %106, %109 : vector<8x128xf32>
    %111 = arith.mulf %103, %110 : vector<8x128xf32>
    %112 = arith.select %92, %111, %86 : vector<8x128xi1>, vector<8x128xf32>
    %113 = arith.select %88, %101, %112 : vector<8x128xi1>, vector<8x128xf32>
    %cst_42 = arith.constant 0.785398185 : f32
    %cst_43 = arith.constant 0.000000e+00 : f32
    %114 = vector.broadcast %cst_42 : f32 to vector<8x128xf32>
    %115 = vector.broadcast %cst_43 : f32 to vector<8x128xf32>
    %116 = arith.select %92, %114, %115 : vector<8x128xi1>, vector<8x128xf32>
    %cst_44 = arith.constant 1.57079637 : f32
    %117 = vector.broadcast %cst_44 : f32 to vector<8x128xf32>
    %118 = arith.select %88, %117, %116 : vector<8x128xi1>, vector<8x128xf32>
    %119 = arith.mulf %113, %113 : vector<8x128xf32>
    %cst_45 = arith.constant 0.0805374458 : f32
    %120 = vector.broadcast %cst_45 : f32 to vector<8x128xf32>
    %121 = arith.mulf %120, %119 : vector<8x128xf32>
    %cst_46 = arith.constant 0.138776854 : f32
    %122 = vector.broadcast %cst_46 : f32 to vector<8x128xf32>
    %123 = arith.subf %121, %122 : vector<8x128xf32>
    %124 = arith.mulf %123, %119 : vector<8x128xf32>
    %cst_47 = arith.constant 0.199777111 : f32
    %125 = vector.broadcast %cst_47 : f32 to vector<8x128xf32>
    %126 = arith.addf %124, %125 : vector<8x128xf32>
    %127 = arith.mulf %126, %119 : vector<8x128xf32>
    %cst_48 = arith.constant 0.333329499 : f32
    %128 = vector.broadcast %cst_48 : f32 to vector<8x128xf32>
    %129 = arith.subf %127, %128 : vector<8x128xf32>
    %130 = arith.addf %118, %113 : vector<8x128xf32>
    %131 = arith.mulf %113, %119 : vector<8x128xf32>
    %132 = arith.mulf %131, %129 : vector<8x128xf32>
    %133 = arith.addf %130, %132 : vector<8x128xf32>
    %134 = arith.mulf %85, %133 : vector<8x128xf32>
    %135 = tpu.reciprocal %25 {approx = true} : vector<8x128xf32> -> vector<8x128xf32>
    %136 = arith.mulf %25, %135 : vector<8x128xf32>
    %cst_49 = arith.constant 2.000000e+00 : f32
    %137 = vector.broadcast %cst_49 : f32 to vector<8x128xf32>
    %138 = arith.subf %137, %136 : vector<8x128xf32>
    %139 = arith.mulf %135, %138 : vector<8x128xf32>
    %140 = arith.mulf %22, %139 : vector<8x128xf32>
    %cst_50 = arith.constant 0.000000e+00 : f32
    %141 = vector.broadcast %cst_50 : f32 to vector<8x128xf32>
    %142 = arith.cmpf olt, %140, %141 : vector<8x128xf32>
    %cst_51 = arith.constant -1.000000e+00 : f32
    %cst_52 = arith.constant 1.000000e+00 : f32
    %143 = vector.broadcast %cst_51 : f32 to vector<8x128xf32>
    %144 = vector.broadcast %cst_52 : f32 to vector<8x128xf32>
    %145 = arith.select %142, %143, %144 : vector<8x128xi1>, vector<8x128xf32>
    %146 = math.absf %140 : vector<8x128xf32>
    %cst_53 = arith.constant 2.41421366 : f32
    %147 = vector.broadcast %cst_53 : f32 to vector<8x128xf32>
    %148 = arith.cmpf ogt, %146, %147 : vector<8x128xf32>
    %cst_54 = arith.constant 0.414213568 : f32
    %149 = vector.broadcast %cst_54 : f32 to vector<8x128xf32>
    %150 = arith.cmpf ogt, %146, %149 : vector<8x128xf32>
    %cst_55 = arith.constant dense<true> : vector<8x128xi1>
    %151 = arith.xori %148, %cst_55 : vector<8x128xi1>
    %152 = arith.andi %150, %151 : vector<8x128xi1>
    %cst_56 = arith.constant 1.000000e+00 : f32
    %153 = vector.broadcast %cst_56 : f32 to vector<8x128xf32>
    %154 = arith.maximumf %146, %153 : vector<8x128xf32>
    %155 = tpu.reciprocal %154 {approx = true} : vector<8x128xf32> -> vector<8x128xf32>
    %156 = arith.mulf %154, %155 : vector<8x128xf32>
    %cst_57 = arith.constant 2.000000e+00 : f32
    %157 = vector.broadcast %cst_57 : f32 to vector<8x128xf32>
    %158 = arith.subf %157, %156 : vector<8x128xf32>
    %159 = arith.mulf %155, %158 : vector<8x128xf32>
    %cst_58 = arith.constant 0.000000e+00 : f32
    %160 = vector.broadcast %cst_58 : f32 to vector<8x128xf32>
    %161 = arith.subf %160, %159 : vector<8x128xf32>
    %cst_59 = arith.constant 1.000000e+00 : f32
    %162 = vector.broadcast %cst_59 : f32 to vector<8x128xf32>
    %163 = arith.subf %146, %162 : vector<8x128xf32>
    %cst_60 = arith.constant 1.000000e+00 : f32
    %164 = vector.broadcast %cst_60 : f32 to vector<8x128xf32>
    %165 = arith.addf %146, %164 : vector<8x128xf32>
    %166 = tpu.reciprocal %165 {approx = true} : vector<8x128xf32> -> vector<8x128xf32>
    %167 = arith.mulf %165, %166 : vector<8x128xf32>
    %cst_61 = arith.constant 2.000000e+00 : f32
    %168 = vector.broadcast %cst_61 : f32 to vector<8x128xf32>
    %169 = arith.subf %168, %167 : vector<8x128xf32>
    %170 = arith.mulf %166, %169 : vector<8x128xf32>
    %171 = arith.mulf %163, %170 : vector<8x128xf32>
    %172 = arith.select %152, %171, %146 : vector<8x128xi1>, vector<8x128xf32>
    %173 = arith.select %148, %161, %172 : vector<8x128xi1>, vector<8x128xf32>
    %cst_62 = arith.constant 0.785398185 : f32
    %cst_63 = arith.constant 0.000000e+00 : f32
    %174 = vector.broadcast %cst_62 : f32 to vector<8x128xf32>
    %175 = vector.broadcast %cst_63 : f32 to vector<8x128xf32>
    %176 = arith.select %152, %174, %175 : vector<8x128xi1>, vector<8x128xf32>
    %cst_64 = arith.constant 1.57079637 : f32
    %177 = vector.broadcast %cst_64 : f32 to vector<8x128xf32>
    %178 = arith.select %148, %177, %176 : vector<8x128xi1>, vector<8x128xf32>
    %179 = arith.mulf %173, %173 : vector<8x128xf32>
    %cst_65 = arith.constant 0.0805374458 : f32
    %180 = vector.broadcast %cst_65 : f32 to vector<8x128xf32>
    %181 = arith.mulf %180, %179 : vector<8x128xf32>
    %cst_66 = arith.constant 0.138776854 : f32
    %182 = vector.broadcast %cst_66 : f32 to vector<8x128xf32>
    %183 = arith.subf %181, %182 : vector<8x128xf32>
    %184 = arith.mulf %183, %179 : vector<8x128xf32>
    %cst_67 = arith.constant 0.199777111 : f32
    %185 = vector.broadcast %cst_67 : f32 to vector<8x128xf32>
    %186 = arith.addf %184, %185 : vector<8x128xf32>
    %187 = arith.mulf %186, %179 : vector<8x128xf32>
    %cst_68 = arith.constant 0.333329499 : f32
    %188 = vector.broadcast %cst_68 : f32 to vector<8x128xf32>
    %189 = arith.subf %187, %188 : vector<8x128xf32>
    %190 = arith.addf %178, %173 : vector<8x128xf32>
    %191 = arith.mulf %173, %179 : vector<8x128xf32>
    %192 = arith.mulf %191, %189 : vector<8x128xf32>
    %193 = arith.addf %190, %192 : vector<8x128xf32>
    %194 = arith.mulf %145, %193 : vector<8x128xf32>
    %195 = arith.subf %134, %194 : vector<8x128xf32>
    %cst_69 = arith.constant 0.405284733 : f32
    %196 = vector.broadcast %cst_69 : f32 to vector<8x128xf32>
    %197 = arith.mulf %196, %195 : vector<8x128xf32>
    %198 = arith.mulf %197, %195 : vector<8x128xf32>
    %199 = arith.subf %198, %52 : vector<8x128xf32>
    %cst_70 = arith.constant 1.00000012 : f32
    %200 = vector.broadcast %cst_70 : f32 to vector<8x128xf32>
    %201 = arith.addf %199, %200 : vector<8x128xf32>
    %202 = tpu.reciprocal %201 {approx = true} : vector<8x128xf32> -> vector<8x128xf32>
    %203 = arith.mulf %201, %202 : vector<8x128xf32>
    %cst_71 = arith.constant 2.000000e+00 : f32
    %204 = vector.broadcast %cst_71 : f32 to vector<8x128xf32>
    %205 = arith.subf %204, %203 : vector<8x128xf32>
    %206 = arith.mulf %202, %205 : vector<8x128xf32>
    %207 = arith.mulf %198, %206 : vector<8x128xf32>
    %208 = tpu.reciprocal %63 {approx = true} : vector<8x128xf32> -> vector<8x128xf32>
    %209 = arith.mulf %63, %208 : vector<8x128xf32>
    %cst_72 = arith.constant 2.000000e+00 : f32
    %210 = vector.broadcast %cst_72 : f32 to vector<8x128xf32>
    %211 = arith.subf %210, %209 : vector<8x128xf32>
    %212 = arith.mulf %208, %211 : vector<8x128xf32>
    %213 = arith.mulf %74, %212 : vector<8x128xf32>
    %214 = arith.mulf %198, %207 : vector<8x128xf32>
    %215 = arith.addf %213, %214 : vector<8x128xf32>
    %216 = arith.subf %52, %215 : vector<8x128xf32>
    %cst_73 = arith.constant 1.000000e+00 : f32
    %217 = vector.broadcast %cst_73 : f32 to vector<8x128xf32>
    %218 = arith.subf %217, %216 : vector<8x128xf32>
    %219 = arith.mulf %218, %21 : vector<8x128xf32>
    %cst_74 = arith.constant dense<0.000000e+00> : vector<8xf32>
    %220 = vector.multi_reduction <add>, %219, %cst_74 [1] : vector<8x128xf32> to vector<8xf32>
    %221 = vector.shape_cast %220 : vector<8xf32> to vector<8x1xf32>
    %cst_75 = arith.constant dense<0.000000e+00> : vector<1xf32>
    %222 = vector.multi_reduction <add>, %221, %cst_75 [0] : vector<8x1xf32> to vector<1xf32>
    %223 = vector.shape_cast %222 : vector<1xf32> to vector<1x1xf32>
    %224 = arith.subf %17, %9 : vector<8x128xf32>
    %cst_76 = arith.constant 0.000000e+00 : f32
    %cst_77 = arith.constant 1.499000e+01 : f32
    %225 = vector.broadcast %cst_76 : f32 to vector<8x128xf32>
    %226 = arith.maximumf %225, %224 : vector<8x128xf32>
    %227 = vector.broadcast %cst_77 : f32 to vector<8x128xf32>
    %228 = arith.minimumf %227, %226 : vector<8x128xf32>
    %229 = arith.subf %19, %11 : vector<8x128xf32>
    %cst_78 = arith.constant 0.000000e+00 : f32
    %cst_79 = arith.constant 1.499000e+01 : f32
    %230 = vector.broadcast %cst_78 : f32 to vector<8x128xf32>
    %231 = arith.maximumf %230, %229 : vector<8x128xf32>
    %232 = vector.broadcast %cst_79 : f32 to vector<8x128xf32>
    %233 = arith.minimumf %232, %231 : vector<8x128xf32>
    %234 = arith.subf %13, %17 : vector<8x128xf32>
    %cst_80 = arith.constant 0.000000e+00 : f32
    %cst_81 = arith.constant 1.499000e+01 : f32
    %235 = vector.broadcast %cst_80 : f32 to vector<8x128xf32>
    %236 = arith.maximumf %235, %234 : vector<8x128xf32>
    %237 = vector.broadcast %cst_81 : f32 to vector<8x128xf32>
    %238 = arith.minimumf %237, %236 : vector<8x128xf32>
    %239 = arith.subf %15, %19 : vector<8x128xf32>
    %cst_82 = arith.constant 0.000000e+00 : f32
    %cst_83 = arith.constant 1.499000e+01 : f32
    %240 = vector.broadcast %cst_82 : f32 to vector<8x128xf32>
    %241 = arith.maximumf %240, %239 : vector<8x128xf32>
    %242 = vector.broadcast %cst_83 : f32 to vector<8x128xf32>
    %243 = arith.minimumf %242, %241 : vector<8x128xf32>
    %244 = tpu.iota {dimensions = array<i32: 0>} : vector<16x8x128xi32>
    %245 = arith.sitofp %244 : vector<16x8x128xi32> to vector<16x8x128xf32>
    %c0_84 = arith.constant 0 : index
    %c0_85 = arith.constant 0 : index
    %c0_86 = arith.constant 0 : index
    %c0_87 = arith.constant 0 : index
    %246 = vector.load %arg2[%c0_84, %c0_85, %c0_86, %c0_87] : memref<4x16x8x128xf32, #tpu.memory_space<vmem>>, vector<1x16x8x128xf32>
    %247 = vector.shape_cast %246 : vector<1x16x8x128xf32> to vector<16x8x128xf32>
    %cst_88 = arith.constant dense<0xFF800000> : vector<8x128xf32>
    %248 = vector.multi_reduction <maximumf>, %247, %cst_88 [0] : vector<16x8x128xf32> to vector<8x128xf32>
    %249 = vector.shape_cast %248 : vector<8x128xf32> to vector<1x8x128xf32>
    %250 = vector.broadcast %249 : vector<1x8x128xf32> to vector<16x8x128xf32>
    %251 = arith.subf %247, %250 : vector<16x8x128xf32>
    %252 = math.exp %251 : vector<16x8x128xf32>
    %cst_89 = arith.constant dense<0.000000e+00> : vector<8x128xf32>
    %253 = vector.multi_reduction <add>, %252, %cst_89 [0] : vector<16x8x128xf32> to vector<8x128xf32>
    %254 = math.log %253 : vector<8x128xf32>
    %255 = arith.addf %248, %254 : vector<8x128xf32>
    %256 = vector.shape_cast %228 : vector<8x128xf32> to vector<1x8x128xf32>
    %257 = vector.broadcast %256 : vector<1x8x128xf32> to vector<16x8x128xf32>
    %258 = arith.subf %257, %245 : vector<16x8x128xf32>
    %259 = math.absf %258 : vector<16x8x128xf32>
    %cst_90 = arith.constant 1.000000e+00 : f32
    %260 = vector.broadcast %cst_90 : f32 to vector<16x8x128xf32>
    %261 = arith.subf %260, %259 : vector<16x8x128xf32>
    %cst_91 = arith.constant 0.000000e+00 : f32
    %262 = vector.broadcast %cst_91 : f32 to vector<16x8x128xf32>
    %263 = arith.maximumf %261, %262 : vector<16x8x128xf32>
    %264 = arith.mulf %247, %263 : vector<16x8x128xf32>
    %cst_92 = arith.constant dense<0.000000e+00> : vector<8x128xf32>
    %265 = vector.multi_reduction <add>, %264, %cst_92 [0] : vector<16x8x128xf32> to vector<8x128xf32>
    %266 = arith.subf %255, %265 : vector<8x128xf32>
    %c1_93 = arith.constant 1 : index
    %c0_94 = arith.constant 0 : index
    %c0_95 = arith.constant 0 : index
    %c0_96 = arith.constant 0 : index
    %267 = vector.load %arg2[%c1_93, %c0_94, %c0_95, %c0_96] : memref<4x16x8x128xf32, #tpu.memory_space<vmem>>, vector<1x16x8x128xf32>
    %268 = vector.shape_cast %267 : vector<1x16x8x128xf32> to vector<16x8x128xf32>
    %cst_97 = arith.constant dense<0xFF800000> : vector<8x128xf32>
    %269 = vector.multi_reduction <maximumf>, %268, %cst_97 [0] : vector<16x8x128xf32> to vector<8x128xf32>
    %270 = vector.shape_cast %269 : vector<8x128xf32> to vector<1x8x128xf32>
    %271 = vector.broadcast %270 : vector<1x8x128xf32> to vector<16x8x128xf32>
    %272 = arith.subf %268, %271 : vector<16x8x128xf32>
    %273 = math.exp %272 : vector<16x8x128xf32>
    %cst_98 = arith.constant dense<0.000000e+00> : vector<8x128xf32>
    %274 = vector.multi_reduction <add>, %273, %cst_98 [0] : vector<16x8x128xf32> to vector<8x128xf32>
    %275 = math.log %274 : vector<8x128xf32>
    %276 = arith.addf %269, %275 : vector<8x128xf32>
    %277 = vector.shape_cast %233 : vector<8x128xf32> to vector<1x8x128xf32>
    %278 = vector.broadcast %277 : vector<1x8x128xf32> to vector<16x8x128xf32>
    %279 = arith.subf %278, %245 : vector<16x8x128xf32>
    %280 = math.absf %279 : vector<16x8x128xf32>
    %cst_99 = arith.constant 1.000000e+00 : f32
    %281 = vector.broadcast %cst_99 : f32 to vector<16x8x128xf32>
    %282 = arith.subf %281, %280 : vector<16x8x128xf32>
    %cst_100 = arith.constant 0.000000e+00 : f32
    %283 = vector.broadcast %cst_100 : f32 to vector<16x8x128xf32>
    %284 = arith.maximumf %282, %283 : vector<16x8x128xf32>
    %285 = arith.mulf %268, %284 : vector<16x8x128xf32>
    %cst_101 = arith.constant dense<0.000000e+00> : vector<8x128xf32>
    %286 = vector.multi_reduction <add>, %285, %cst_101 [0] : vector<16x8x128xf32> to vector<8x128xf32>
    %287 = arith.subf %276, %286 : vector<8x128xf32>
    %288 = arith.addf %266, %287 : vector<8x128xf32>
    %c2_102 = arith.constant 2 : index
    %c0_103 = arith.constant 0 : index
    %c0_104 = arith.constant 0 : index
    %c0_105 = arith.constant 0 : index
    %289 = vector.load %arg2[%c2_102, %c0_103, %c0_104, %c0_105] : memref<4x16x8x128xf32, #tpu.memory_space<vmem>>, vector<1x16x8x128xf32>
    %290 = vector.shape_cast %289 : vector<1x16x8x128xf32> to vector<16x8x128xf32>
    %cst_106 = arith.constant dense<0xFF800000> : vector<8x128xf32>
    %291 = vector.multi_reduction <maximumf>, %290, %cst_106 [0] : vector<16x8x128xf32> to vector<8x128xf32>
    %292 = vector.shape_cast %291 : vector<8x128xf32> to vector<1x8x128xf32>
    %293 = vector.broadcast %292 : vector<1x8x128xf32> to vector<16x8x128xf32>
    %294 = arith.subf %290, %293 : vector<16x8x128xf32>
    %295 = math.exp %294 : vector<16x8x128xf32>
    %cst_107 = arith.constant dense<0.000000e+00> : vector<8x128xf32>
    %296 = vector.multi_reduction <add>, %295, %cst_107 [0] : vector<16x8x128xf32> to vector<8x128xf32>
    %297 = math.log %296 : vector<8x128xf32>
    %298 = arith.addf %291, %297 : vector<8x128xf32>
    %299 = vector.shape_cast %238 : vector<8x128xf32> to vector<1x8x128xf32>
    %300 = vector.broadcast %299 : vector<1x8x128xf32> to vector<16x8x128xf32>
    %301 = arith.subf %300, %245 : vector<16x8x128xf32>
    %302 = math.absf %301 : vector<16x8x128xf32>
    %cst_108 = arith.constant 1.000000e+00 : f32
    %303 = vector.broadcast %cst_108 : f32 to vector<16x8x128xf32>
    %304 = arith.subf %303, %302 : vector<16x8x128xf32>
    %cst_109 = arith.constant 0.000000e+00 : f32
    %305 = vector.broadcast %cst_109 : f32 to vector<16x8x128xf32>
    %306 = arith.maximumf %304, %305 : vector<16x8x128xf32>
    %307 = arith.mulf %290, %306 : vector<16x8x128xf32>
    %cst_110 = arith.constant dense<0.000000e+00> : vector<8x128xf32>
    %308 = vector.multi_reduction <add>, %307, %cst_110 [0] : vector<16x8x128xf32> to vector<8x128xf32>
    %309 = arith.subf %298, %308 : vector<8x128xf32>
    %310 = arith.addf %288, %309 : vector<8x128xf32>
    %c3_111 = arith.constant 3 : index
    %c0_112 = arith.constant 0 : index
    %c0_113 = arith.constant 0 : index
    %c0_114 = arith.constant 0 : index
    %311 = vector.load %arg2[%c3_111, %c0_112, %c0_113, %c0_114] : memref<4x16x8x128xf32, #tpu.memory_space<vmem>>, vector<1x16x8x128xf32>
    %312 = vector.shape_cast %311 : vector<1x16x8x128xf32> to vector<16x8x128xf32>
    %cst_115 = arith.constant dense<0xFF800000> : vector<8x128xf32>
    %313 = vector.multi_reduction <maximumf>, %312, %cst_115 [0] : vector<16x8x128xf32> to vector<8x128xf32>
    %314 = vector.shape_cast %313 : vector<8x128xf32> to vector<1x8x128xf32>
    %315 = vector.broadcast %314 : vector<1x8x128xf32> to vector<16x8x128xf32>
    %316 = arith.subf %312, %315 : vector<16x8x128xf32>
    %317 = math.exp %316 : vector<16x8x128xf32>
    %cst_116 = arith.constant dense<0.000000e+00> : vector<8x128xf32>
    %318 = vector.multi_reduction <add>, %317, %cst_116 [0] : vector<16x8x128xf32> to vector<8x128xf32>
    %319 = math.log %318 : vector<8x128xf32>
    %320 = arith.addf %313, %319 : vector<8x128xf32>
    %321 = vector.shape_cast %243 : vector<8x128xf32> to vector<1x8x128xf32>
    %322 = vector.broadcast %321 : vector<1x8x128xf32> to vector<16x8x128xf32>
    %323 = arith.subf %322, %245 : vector<16x8x128xf32>
    %324 = math.absf %323 : vector<16x8x128xf32>
    %cst_117 = arith.constant 1.000000e+00 : f32
    %325 = vector.broadcast %cst_117 : f32 to vector<16x8x128xf32>
    %326 = arith.subf %325, %324 : vector<16x8x128xf32>
    %cst_118 = arith.constant 0.000000e+00 : f32
    %327 = vector.broadcast %cst_118 : f32 to vector<16x8x128xf32>
    %328 = arith.maximumf %326, %327 : vector<16x8x128xf32>
    %329 = arith.mulf %312, %328 : vector<16x8x128xf32>
    %cst_119 = arith.constant dense<0.000000e+00> : vector<8x128xf32>
    %330 = vector.multi_reduction <add>, %329, %cst_119 [0] : vector<16x8x128xf32> to vector<8x128xf32>
    %331 = arith.subf %320, %330 : vector<8x128xf32>
    %332 = arith.addf %310, %331 : vector<8x128xf32>
    %cst_120 = arith.constant 2.500000e-01 : f32
    %333 = vector.broadcast %cst_120 : f32 to vector<8x128xf32>
    %334 = arith.mulf %332, %333 : vector<8x128xf32>
    %335 = arith.mulf %334, %21 : vector<8x128xf32>
    %cst_121 = arith.constant dense<0.000000e+00> : vector<8xf32>
    %336 = vector.multi_reduction <add>, %335, %cst_121 [1] : vector<8x128xf32> to vector<8xf32>
    %337 = vector.shape_cast %336 : vector<8xf32> to vector<8x1xf32>
    %cst_122 = arith.constant dense<0.000000e+00> : vector<1xf32>
    %338 = vector.multi_reduction <add>, %337, %cst_122 [0] : vector<8x1xf32> to vector<1xf32>
    %339 = vector.shape_cast %338 : vector<1xf32> to vector<1x1xf32>
    %340 = vector.shape_cast %223 : vector<1x1xf32> to vector<1x1x1xf32>
    %c0_123 = arith.constant 0 : index
    %c0_124 = arith.constant 0 : index
    %c0_125 = arith.constant 0 : index
    %341 = vector.load %arg3[%c0_123, %c0_124, %c0_125] : memref<1x1x1xf32, #tpu.memory_space<vmem>>, vector<1x1x1xf32>
    tpu.vector_store %arg3[%c0_123, %c0_124, %c0_125], %340 {strides = array<i32>} : memref<1x1x1xf32, #tpu.memory_space<vmem>>, vector<1x1x1xf32>,
    %342 = vector.shape_cast %339 : vector<1x1xf32> to vector<1x1x1xf32>
    %c0_126 = arith.constant 0 : index
    %c0_127 = arith.constant 0 : index
    %c0_128 = arith.constant 0 : index
    %343 = vector.load %arg4[%c0_126, %c0_127, %c0_128] : memref<1x1x1xf32, #tpu.memory_space<vmem>>, vector<1x1x1xf32>
    tpu.vector_store %arg4[%c0_126, %c0_127, %c0_128], %342 {strides = array<i32>} : memref<1x1x1xf32, #tpu.memory_space<vmem>>, vector<1x1x1xf32>,
    return
  }
  func.func @transform_0(%arg0: i32) -> (i32, i32, i32) {
    %c0_i32 = arith.constant 0 : i32
    %c0_i32_0 = arith.constant 0 : i32
    %c0_i32_1 = arith.constant 0 : i32
    return %c0_i32, %arg0, %c0_i32_0 : i32, i32, i32
  }
  func.func @transform_1(%arg0: i32) -> (i32, i32, i32, i32) {
    %c0_i32 = arith.constant 0 : i32
    %c0_i32_0 = arith.constant 0 : i32
    %c0_i32_1 = arith.constant 0 : i32
    %c0_i32_2 = arith.constant 0 : i32
    return %c0_i32, %c0_i32_0, %arg0, %c0_i32_1 : i32, i32, i32, i32
  }
  func.func @transform_2(%arg0: i32) -> (i32, i32, i32) {
    %c0_i32 = arith.constant 0 : i32
    %c0_i32_0 = arith.constant 0 : i32
    %c0_i32_1 = arith.constant 0 : i32
    return %arg0, %c0_i32, %c0_i32_0 : i32, i32, i32
  }
  func.func @transform_3(%arg0: i32) -> (i32, i32, i32) {
    %c0_i32 = arith.constant 0 : i32
    %c0_i32_0 = arith.constant 0 : i32
    %c0_i32_1 = arith.constant 0 : i32
    return %arg0, %c0_i32, %c0_i32_0 : i32, i32, i32
  }
}

</mosaic_0001>

<bundles_post_ra>
// kernel: tpu_custom_call.1
= control target key start
LH: loop header
LB: loop body
LE: loop exit
PB: predicated region body
PF: predicated region fallthrough
CT: control target
= control target key end

     0   :  { %9 = vsyncpa [#allocation3], 0  ;;  %s2276_s0 = inlined_call_operand.hbm [shape: f32[11,8,128], index: 0, kind: input, shape index: {}]   ;;  %s2277_s1 = inlined_call_operand.hbm [shape: f32[4,16,8,128], index: 1, kind: input, shape index: {}]   ;;  %s2278_s2 = inlined_call_operand.hbm [shape: f32[1,1,1], index: 2, kind: output, shape index: {0}]   ;;  %s2279_s3 = inlined_call_operand.hbm [shape: f32[1,1,1], index: 3, kind: output, shape index: {1}]  }
   0x1   :  { %10 = vsyncpa [#allocation6], 0 }
   0x2   :  { %11 = vsyncpa [#allocation4], 0 }
   0x3   :  { %12 = vsyncpa [#allocation9], 0  ;;  %s1396_s12 = smov [#allocation2]   ;;  %s1300_s16 = scalar_lea.hbm %s2276_s0, 1408 }
   0x4   :  { %s18_s13 = sshll.u32 %s1396_s12, 4  ;;  %p1301_p0 = scmp.ne.s32.totalorder %s2276_s0, %s1300_s16  ;;  %s19_s13 = int_to_ptr.vmem [resolvable:$true] %s18_s13 }
   0x5   :  { %p1304_p1 = scmp.lt.u32.totalorder %s1300_s16, %s2276_s0 }
   0x7   :  { %p1306_p2 = pnand %p1304_p1, %p1301_p0 }
   0x9   :  { %1309 = shalt.err (!%p1306_p2)
}
   0xa   :  { %s1310_s21 = scalar_lea.vmem %s19_s13, 1408  ;;  %p1315_p4 = scmp.lt.s32.totalorder %s19_s13, %s19_s13 }
   0xb   :  { %p1311_p3 = scmp.ne.s32.totalorder %s19_s13, %s1310_s21  ;;  %p1316_p5 = scmp.lt.s32.totalorder %s1310_s21, %s1310_s21 }
   0xd   :  { %p1317_p6 = por %p1316_p5, %p1315_p4 }
   0xf   :  { %p1318_p7 = pnand %p1317_p6, %p1311_p3 }
  0x11   :  { %1321 = shalt.err (!%p1318_p7)
}
  0x12   :  { %s1397_s22 = smov 128   ;;  %s1398_s23 = smov 8  }
  0x13   :  { %24 = dma.hbm_to_vmem [thread:$0]  %s2276_s0, 1408, %s19_s13, [#allocation3], %s1397_s22, %s1397_s22, %s1398_s23  }
  0x14   :  { %s1399_s26 = smov [#allocation5]   ;;  %s1322_s30 = scalar_lea.hbm %s2277_s1, 8192 }
  0x15   :  { %s30_s27 = sshll.u32 %s1399_s26, 4  ;;  %p1323_p8 = scmp.ne.s32.totalorder %s2277_s1, %s1322_s30  ;;  %s31_s27 = int_to_ptr.vmem [resolvable:$true] %s30_s27 }
  0x16   :  { %p1326_p9 = scmp.lt.u32.totalorder %s1322_s30, %s2277_s1 }
  0x18   :  { %p1328_p10 = pnand %p1326_p9, %p1323_p8 }
  0x1a   :  { %1331 = shalt.err (!%p1328_p10)
}
  0x1b   :  { %s1332_s8 = scalar_lea.vmem %s31_s27, 8192  ;;  %p1337_p12 = scmp.lt.s32.totalorder %s31_s27, %s31_s27 }
  0x1c   :  { %p1333_p11 = scmp.ne.s32.totalorder %s31_s27, %s1332_s8  ;;  %p1338_p13 = scmp.lt.s32.totalorder %s1332_s8, %s1332_s8 }
  0x1e   :  { %p1339_p0 = por %p1338_p13, %p1337_p12 }
  0x20   :  { %p1340_p1 = pnand %p1339_p0, %p1333_p11 }
  0x22   :  { %1343 = shalt.err (!%p1340_p1)
}
  0x23   :  { %36 = dma.hbm_to_vmem [thread:$0]  %s2277_s1, 8192, %s31_s27, [#allocation6], %s1397_s22, %s1397_s22, %s1398_s23  }
  0x24   :  { %1388 = dma.done.wait [#allocation3], 1408  }
  0x25   :  { %1389 = vsyncadd [#allocation3], 4294965888 }
  0x26   :  { %1390 = dma.done.wait [#allocation6], 8192  }
  0x27   :  { %1391 = vsyncadd [#allocation6], 4294959104  ;;  %v43_v0 = vld [vmem:[#allocation2] sm:$0xff]  ;;  %v45_v1 = vld [vmem:[#allocation2 + $0x8] sm:$0xff]  ;;  %vm1400_vm6 = vmmov 1   ;;  %vm1035_vm11 = vcmask 0  }
  0x28   :  { %v47_v2 = vld [vmem:[#allocation2 + $0x10] sm:$0xff]  ;;  %v49_v3 = vld [vmem:[#allocation2 + $0x18] sm:$0xff]  ;;  %v1449_v4 = vld [vmem:[#allocation2 + $0x20] sm:$0xff]  ;;  %s1403_s1 = smov [#allocation7]  }
  0x29   :  { %v1451_v5 = vld [vmem:[#allocation2 + $0x28] sm:$0xff]  ;;  %v1453_v6 = vsub.f32 %v47_v2, %v43_v0  ;;  %v1455_v7 = vld [vmem:[#allocation2 + $0x30] sm:$0xff]  ;;  %v57_v8 = vld [vmem:[#allocation2 + $0x38] sm:$0xff]  ;;  %v65_v9 = vsub.f32 %v49_v3, %v45_v1  ;;  %v71_v10 = vmax.f32 %v43_v0, %v1449_v4  ;;  %v90_v12 = vmin.f32 %v43_v0, %v1449_v4  ;;  %s1044_s10 = sshll.u32 %s1403_s1, 4  ;;  %s1045_s10 = int_to_ptr.vmem [resolvable:$true] %s1044_s10 }
  0x2a   :  { %v75_v11 = vmax.f32 %v45_v1, %v1451_v5  ;;  %v1462_v13 = vsub.f32 %v1455_v7, %v1449_v4  ;;  %v68_v14 = vsub.f32 %v57_v8, %v1451_v5  ;;  %v70_v15 = vmin.f32 %v47_v2, %v1455_v7  ;;  %v1479_v41 = vld [vmem:[#allocation5] sm:$0xff]  ;;  %v1484_v47 = vld [vmem:[#allocation5 + $0x8] sm:$0xff]  ;;  %v1486_v48 = vld [vmem:[#allocation5 + $0x10] sm:$0xff]  ;;  %s1344_s11 = scalar_lea.vmem %s1045_s10, 16  ;;  %s1348_s12 = scalar_lea.vmem %s1045_s10, 32 }
  0x2b   :  { %v74_v16 = vmin.f32 %v49_v3, %v57_v8  ;;  %v1466_v17 = vadd.f32 1e-07, %v65_v9  ;;  %v89_v18 = vmax.f32 %v47_v2, %v1455_v7  ;;  %v92_v19 = vmax.f32 %v49_v3, %v57_v8  ;;  %v1481_v42 = vld [vmem:[#allocation5 + $0x20] sm:$0xff]  ;;  %v1488_v49 = vld [vmem:[#allocation5 + $0x28] sm:$0xff]  ;;  %v1490_v50 = vld [vmem:[#allocation5 + $0x18] sm:$0xff]  ;;  %p1345_p2 = scmp.ne.s32.totalorder %s1045_s10, %s1344_s11  ;;  %p1349_p3 = scmp.lt.s32.totalorder %s1045_s10, %s1045_s10 }
  0x2c   :  { %v93_v20 = vmin.f32 %v45_v1, %v1451_v5  ;;  %v69_v21 = vadd.f32 1e-07, %v68_v14  ;;  %v72_v22 = vsub.f32 %v70_v15, %v71_v10  ;;  %v99_v24 = vadd.f32 %v1455_v7, %v1449_v4  ;;  %v1492_v51 = vld [vmem:[#allocation5 + $0x30] sm:$0xff]  ;;  %v1494_v52 = vld [vmem:[#allocation5 + $0x38] sm:$0xff]  ;;  %v59_v55 = vld [vmem:[#allocation2 + $0x40] sm:$0xff]  ;;  %p1350_p4 = scmp.lt.s32.totalorder %s1348_s12, %s1344_s11 }
  0x2d   :  { %v76_v23 = vsub.f32 %v74_v16, %v75_v11  ;;  %v79_v25 = vmul.f32 %v1466_v17, %v1453_v6  ;;  %v91_v26 = vsub.f32 %v89_v18, %v90_v12  ;;  %v102_v28 = vadd.f32 %v57_v8, %v1451_v5  ;;  %v1498_v56 = vld [vmem:[#allocation5 + $0x40] sm:$0xff]  ;;  %v1500_v57 = vld [vmem:[#allocation5 + $0x48] sm:$0xff]  ;;  %v1502_v58 = vld [vmem:[#allocation5 + $0x50] sm:$0xff] }
  0x2e   :  { %v94_v27 = vsub.f32 %v92_v19, %v93_v20  ;;  %v73_v29 = vmax.f32 %v72_v22, 0.0  ;;  %v80_v31 = vmul.f32 %v69_v21, %v1462_v13  ;;  %v100_v32 = vsub.f32 %v99_v24, %v43_v0  ;;  %2292 = vst [vmem:[#allocation14_spill] sm:$0xff] %v1502_v58  ;;  %v1504_v59 = vld [vmem:[#allocation5 + $0x58] sm:$0xff]  ;;  %v1519_v14 = vld [vmem:[#allocation5 + $0x68] sm:$0xff]  ;;  %v1521_v15 = vld [vmem:[#allocation5 + $0x70] sm:$0xff]  ;;  %p1351_p5 = por %p1350_p4, %p1349_p3 }
  0x2f   :  { %v77_v30 = vmax.f32 %v76_v23, 0.0  ;;  %v95_v33 = vmul.f32 %v91_v26, %v91_v26  ;;  %v103_v35 = vsub.f32 %v102_v28, %v45_v1  ;;  %1143 = vrcp.f32 %v69_v21  ;;  %2293 = vst [vmem:[#allocation15_spill] sm:$0xff] %v1504_v59  ;;  %2295 = vst [vmem:[#allocation17_spill] sm:$0xff] %v1519_v14  ;;  %v1523_v16 = vld [vmem:[#allocation5 + $0x78] sm:$0xff]  ;;  %v61_v19 = vld [vmem:[#allocation2 + $0x48] sm:$0xff] }
  0x30   :  { %v96_v34 = vmul.f32 %v94_v27, %v94_v27  ;;  %v81_v37 = vadd.f32 %v80_v31, %v79_v25  ;;  %v101_v38 = vsub.f32 %v100_v32, %v47_v2  ;;  %1145 = vrcp.f32 %v1466_v17  ;;  %2296 = vst [vmem:[#allocation18_spill] sm:$0xff] %v1521_v15  ;;  %p1352_p6 = pnand %p1351_p5, %p1345_p2 }
  0x31   :  { %v1476_v36 = vmul.f32 %v77_v30, %v73_v29  ;;  %v104_v40 = vsub.f32 %v103_v35, %v49_v3  ;;  %v263_v53 = vmax.f32 %v1479_v41, %v1481_v42  ;;  %v264_v60 = vmax.f32 %v1484_v47, %v1488_v49  ;;  %v1514_v3 = vld [vmem:[#allocation5 + $0x60] sm:$0xff] }
  0x32   :  { %v97_v39 = vadd.f32 %v96_v34, %v95_v33  ;;  %v105_v43 = vmul.f32 %v101_v38, %v101_v38  ;;  %v265_v62 = vmax.f32 %v1486_v48, %v1492_v51  ;;  %v266_v63 = vmax.f32 %v1490_v50, %v1494_v52  ;;  %2294 = vst [vmem:[#allocation16_spill] sm:$0xff] %v1514_v3 }
  0x33   :  { %v82_v44 = vsub.f32 %v81_v37, %v1476_v36  ;;  %v106_v46 = vmul.f32 %v104_v40, %v104_v40  ;;  %v219_v0 = vsub.f32 %v59_v55, %v1449_v4  ;;  %v267_v1 = vmax.f32 %v263_v53, %v1498_v56 }
  0x34   :  { %v98_v45 = vadd.f32 1e-07, %v97_v39  ;;  %v268_v8 = vmax.f32 %v264_v60, %v1500_v57  ;;  %v269_v9 = vmax.f32 %v265_v62, %v1502_v58  ;;  %v270_v10 = vmax.f32 %v266_v63, %v1504_v59 }
  0x35   :  { %v107_v54 = vadd.f32 %v106_v46, %v105_v43  ;;  %v83_v61 = vadd.f32 1e-07, %v82_v44  ;;  %v220_v20 = vmax.f32 %v219_v0, 0.0  ;;  %v271_v22 = vmax.f32 %v267_v1, %v1514_v3 }
  0x36   :  { %1147 = vrcp.f32 %v98_v45  ;;  %v272_v24 = vmax.f32 %v268_v8, %v1519_v14  ;;  %v273_v25 = vmax.f32 %v269_v9, %v1521_v15  ;;  %v222_v29 = vsub.f32 %v61_v19, %v1451_v5 }
  0x37   :  { %1149 = vrcp.f32 %v83_v61  ;;  %v225_v30 = vsub.f32 %v1455_v7, %v59_v55  ;;  %v1535_v32 = vmin.f32 %v220_v20, 14.99  ;;  %v108_v38 = vmul.f32 0.25, %v107_v54 }
  0x38   :  { %v275_v34 = vmax.f32 %v271_v22, %v272_v24  ;;  %v1546_v5 = vmax.f32 %v222_v29, 0.0 }
  0x39   :  { %v1144_v2 = vpop.eup %1143  ;;  %v1548_v7 = vmax.f32 %v225_v30, 0.0  ;;  %v1552_v43 = vadd.f32 -1.0, %v1535_v32  ;;  %v1561_v53 = vadd.f32 -3.0, %v1535_v32  ;;  %v1564_v54 = vadd.f32 -4.0, %v1535_v32 }
  0x3a   :  { %v1146_v11 = vpop.eup %1145  ;;  %v110_v12 = vmul.f32 %v1144_v2, %v69_v21  ;;  %v274_v21 = vmax.f32 %v270_v10, %v1523_v16  ;;  %2297 = vst [vmem:[#allocation19_spill] sm:$0xff] %v1546_v5  ;;  %v1568_v60 = vadd.f32 -5.0, %v1535_v32  ;;  %v1571_v62 = vadd.f32 -6.0, %v1535_v32 }
  0x3b   :  { %v151_v4 = vmul.f32 %v1146_v11, %v1466_v17  ;;  %2298 = vst [vmem:[#allocation20_spill] sm:$0xff] %v1548_v7  ;;  %v1575_v0 = vadd.f32 -7.0, %v1535_v32  ;;  %v1578_v1 = vadd.f32 -8.0, %v1535_v32  ;;  %v1581_v9 = vadd.f32 -9.0, %v1535_v32 }
  0x3c   :  { %v111_v18 = vsub.f32 2.0, %v110_v12  ;;  %v276_v35 = vmax.f32 %v273_v25, %v274_v21  ;;  %v1597_v19 = vadd.f32 -11.0, %v1535_v32  ;;  %v1600_v20 = vadd.f32 -12.0, %v1535_v32 }
  0x3d   :  { %v152_v23 = vsub.f32 2.0, %v151_v4  ;;  %v1603_v22 = vadd.f32 -13.0, %v1535_v32  ;;  %v1609_v24 = vadd.f32 -15.0, %v1535_v32 }
  0x3e   :  { %v112_v26 = vmul.f32 %v1144_v2, %v111_v18  ;;  %v1558_v46 = vmax.f32 %v275_v34, %v276_v35  ;;  %v1594_v18 = vadd.f32 -10.0, %v1535_v32 }
  0x3f   :  { %v153_v28 = vmul.f32 %v1146_v11, %v152_v23  ;;  %v1606_v23 = vadd.f32 -14.0, %v1535_v32 }
  0x40   :  { %v1148_v27 = vpop.eup %1147  ;;  %v1533_v17 = vmul.f32 %v112_v26, %v1462_v13  ;;  %2299 = vst [vmem:[#allocation21_spill] sm:$0xff] %v1558_v46  ;;  %v278_v10 = vsub.f32 %v1479_v41, %v1558_v46  ;;  %v279_v11 = vsub.f32 %v1484_v47, %v1558_v46  ;;  %v280_v12 = vsub.f32 %v1486_v48, %v1558_v46 }
  0x41   :  { %v202_v31 = vmul.f32 %v1148_v27, %v98_v45  ;;  %v1538_v33 = vmul.f32 %v153_v28, %v1453_v6  ;;  %v1555_v6 = vadd.f32 -2.0, %v1535_v32  ;;  %v1150_v44 = vpop.eup %1149  ;;  %v282_v21 = vsub.f32 %v1481_v42, %v1558_v46 }
  0x42   :  { %v1541_v37 = vand.u32 2147483647, %v1533_v17  ;;  %v85_v2 = vmul.f32 %v1150_v44, %v83_v61  ;;  %v281_v61 = vsub.f32 %v1490_v50, %v1558_v46  ;;  %v294_v28 = vmul.f32 1.442695, %v278_v10 }
  0x43   :  { %v1544_v39 = vand.u32 2147483647, %v1538_v33  ;;  %v203_v40 = vsub.f32 2.0, %v202_v31  ;;  %v296_v29 = vmul.f32 1.442695, %v279_v11  ;;  %vm114_vm0 = vcmp.lt.f32.partialorder %v1533_v17, 0.0 }
  0x44   :  { %v121_v13 = vmax.f32 %v1541_v37, 1.0  ;;  %v128_v45 = vadd.f32 1.0, %v1541_v37  ;;  %v86_v25 = vsub.f32 2.0, %v85_v2  ;;  %v298_v30 = vmul.f32 1.442695, %v280_v12 }
  0x45   :  { %v162_v55 = vmax.f32 %v1544_v39, 1.0  ;;  %v169_v63 = vadd.f32 1.0, %v1544_v39  ;;  %v204_v8 = vmul.f32 %v1148_v27, %v203_v40  ;;  %v283_v31 = vsub.f32 %v1488_v49, %v1558_v46 }
  0x46   :  { %1151 = vrcp.f32 %v121_v13  ;;  %v300_v34 = vmul.f32 1.442695, %v281_v61  ;;  %vm117_vm1 = vcmp.gt.f32.partialorder %v1541_v37, 2.4142137  ;;  %vm118_vm2 = vcmp.gt.f32.partialorder %v1541_v37, 0.41421357 }
  0x47   :  { %1153 = vrcp.f32 %v128_v45  ;;  %v1589_v4 = vmul.f32 %v204_v8, %v108_v38  ;;  %vm155_vm3 = vcmp.lt.f32.partialorder %v1538_v33, 0.0  ;;  %v1068_v40 = vadd.f32 -1.0, %v1541_v37  ;;  %vm1633_vm7 = vmxor %vm117_vm1, %vm1400_vm6 }
  0x48   :  { %1155 = vrcp.f32 %v162_v55  ;;  %v284_v2 = vsub.f32 %v1492_v51, %v1558_v46  ;;  %v302_v8 = vmul.f32 1.442695, %v282_v21  ;;  %v87_v11 = vmul.f32 %v1150_v44, %v86_v25  ;;  %vm1654_vm9 = vmand %vm118_vm2, %vm1633_vm7 }
  0x49   :  { %1157 = vrcp.f32 %v169_v63  ;;  %2300 = vst [vmem:[#allocation22_spill] sm:$0xff] %v1589_v4  ;;  %vm158_vm4 = vcmp.gt.f32.partialorder %v1544_v39, 2.4142137  ;;  %v285_v27 = vsub.f32 %v1494_v52, %v1558_v46  ;;  %vm159_vm5 = vcmp.gt.f32.partialorder %v1544_v39, 0.41421357 }
  0x4a   :  { %1159 = vpow2.f32 %v294_v28  ;;  %v304_v28 = vmul.f32 1.442695, %v283_v31  ;;  %v286_v21 = vsub.f32 %v1498_v56, %v1558_v46  ;;  %v306_v25 = vmul.f32 1.442695, %v284_v2  ;;  %vm1642_vm8 = vmxor %vm158_vm4, %vm1400_vm6 }
  0x4b   :  { %1161 = vpow2.f32 %v296_v29  ;;  %v1071_v31 = vadd.f32 -1.0, %v1544_v39  ;;  %vm1671_vm10 = vmand %vm159_vm5, %vm1642_vm8 }
  0x4c   :  { %1163 = vpow2.f32 %v298_v30 }
  0x4d   :  { %1165 = vpow2.f32 %v300_v34 }
  0x4e   :  { %1167 = vpow2.f32 %v302_v8  ;;  %v288_v8 = vsub.f32 %v1502_v58, %v1558_v46 }
  0x4f   :  { %1169 = vpow2.f32 %v304_v28  ;;  %v310_v28 = vmul.f32 1.442695, %v286_v21 }
  0x50   :  { %v1152_v38 = vpop.eup %1151  ;;  %1171 = vpow2.f32 %v306_v25  ;;  %v1402_v25 = vmov 0.0  }
  0x51   :  { %v1154_v10 = vpop.eup %1153  ;;  %v123_v12 = vmul.f32 %v1152_v38, %v121_v13 }
  0x52   :  { %v1156_v61 = vpop.eup %1155  ;;  %v130_v35 = vmul.f32 %v1154_v10, %v128_v45 }
  0x53   :  { %v1158_v26 = vpop.eup %1157  ;;  %v124_v4 = vsub.f32 2.0, %v123_v12  ;;  %v164_v7 = vmul.f32 %v1156_v61, %v162_v55  ;;  %v287_v55 = vsub.f32 %v1500_v57, %v1558_v46 }
  0x54   :  { %v131_v44 = vsub.f32 2.0, %v130_v35  ;;  %v171_v45 = vmul.f32 %v1158_v26, %v169_v63  ;;  %v308_v35 = vmul.f32 1.442695, %v285_v27  ;;  %v1401_v63 = vmov 1.0   ;;  %v1160_v17 = vpop.eup %1159 }
  0x55   :  { %v125_v29 = vmul.f32 %v1152_v38, %v124_v4  ;;  %v165_v30 = vsub.f32 2.0, %v164_v7  ;;  %v1648_v4 = vsel %vm114_vm0, -1.0, %v1401_v63  ;;  %v1665_v13 = vsel %vm155_vm3, -1.0, %v1401_v63 }
  0x56   :  { %v132_v34 = vmul.f32 %v1154_v10, %v131_v44  ;;  %v172_v5 = vsub.f32 2.0, %v171_v45  ;;  %v1661_v44 = vmul.f32 %v87_v11, %v1476_v36  ;;  %1173 = vpow2.f32 %v308_v35 }
  0x57   :  { %v126_v38 = vsub.f32 0.0, %v125_v29  ;;  %v166_v2 = vmul.f32 %v1156_v61, %v165_v30  ;;  %v312_v11 = vmul.f32 1.442695, %v287_v55  ;;  %v136_v29 = vsel %vm1654_vm9, 0.7853982, %v1402_v25 }
  0x58   :  { %v133_v10 = vmul.f32 %v1068_v40, %v132_v34  ;;  %v173_v27 = vmul.f32 %v1158_v26, %v172_v5  ;;  %v289_v5 = vsub.f32 %v1504_v59, %v1558_v46  ;;  %v1162_v26 = vpop.eup %1161  ;;  %v290_v30 = vsub.f32 %v1514_v3, %v1558_v46 }
  0x59   :  { %v167_v40 = vsub.f32 0.0, %v166_v2  ;;  %v1164_v21 = vpop.eup %1163  ;;  %v326_v34 = vadd.f32 %v1162_v26, %v1160_v17  ;;  %1175 = vpow2.f32 %v310_v28  ;;  %v314_v55 = vmul.f32 1.442695, %v288_v8 }
  0x5a   :  { %v134_v36 = vsel %vm1654_vm9, %v133_v10, %v1541_v37  ;;  %v174_v33 = vmul.f32 %v1071_v31, %v173_v27  ;;  %v1166_v12 = vpop.eup %1165  ;;  %v177_v7 = vsel %vm1671_vm10, 0.7853982, %v1402_v25  ;;  %v1697_v10 = vld [vmem:[#allocation5 + $0x80] sm:$0xff]  ;;  %v1699_v27 = vld [vmem:[#allocation5 + $0x88] sm:$0xff]  ;;  %1177 = vpow2.f32 %v312_v11 }
  0x5b   :  { %v135_v45 = vsel %vm117_vm1, %v126_v38, %v134_v36  ;;  %v291_v38 = vsub.f32 %v1519_v14, %v1558_v46  ;;  %v327_v2 = vadd.f32 %v1164_v21, %v326_v34  ;;  %v1168_v17 = vpop.eup %1167  ;;  %v316_v28 = vmul.f32 1.442695, %v289_v5  ;;  %v1705_v36 = vld [vmem:[#allocation5 + $0xa8] sm:$0xff] }
  0x5c   :  { %v138_v63 = vmul.f32 %v135_v45, %v135_v45  ;;  %v175_v31 = vsel %vm1671_vm10, %v174_v33, %v1544_v39  ;;  %v137_v61 = vsel %vm117_vm1, 1.5707964, %v136_v29  ;;  %v292_v33 = vsub.f32 %v1521_v15, %v1558_v46  ;;  %v1170_v34 = vpop.eup %1169 }
  0x5d   :  { %v1691_v35 = vsel %vm158_vm4, %v167_v40, %v175_v31  ;;  %v1703_v40 = vld [vmem:[#allocation5 + $0xa0] sm:$0xff]  ;;  %v293_v21 = vsub.f32 %v1523_v16, %v1558_v46  ;;  %v328_v25 = vadd.f32 %v1166_v12, %v327_v2  ;;  %1179 = vpow2.f32 %v314_v55  ;;  %v1172_v15 = vpop.eup %1171 }
  0x5e   :  { %v139_v26 = vmul.f32 0.080537446, %v138_v63  ;;  %v179_v8 = vmul.f32 %v1691_v35, %v1691_v35  ;;  %v318_v11 = vmul.f32 1.442695, %v290_v30  ;;  %v178_v5 = vsel %vm158_vm4, 1.5707964, %v177_v7 }
  0x5f   :  { %v329_v3 = vadd.f32 %v1168_v17, %v328_v25  ;;  %1181 = vpow2.f32 %v316_v28  ;;  %v320_v12 = vmul.f32 1.442695, %v291_v38  ;;  %v322_v2 = vmul.f32 1.442695, %v292_v33 }
  0x60   :  { %v1069_v31 = vadd.f32 -0.13877685, %v139_v26  ;;  %v180_v14 = vmul.f32 0.080537446, %v179_v8  ;;  %v324_v26 = vmul.f32 1.442695, %v293_v21  ;;  %v1174_v55 = vpop.eup %1173  ;;  %1183 = vpow2.f32 %v318_v11 }
  0x61   :  { %v330_v46 = vadd.f32 %v1170_v34, %v329_v3  ;;  %v363_v30 = vand.u32 2147483647, %v1561_v53  ;;  %v364_v17 = vand.u32 2147483647, %v1564_v54  ;;  %v365_v37 = vand.u32 2147483647, %v1568_v60 }
  0x62   :  { %v141_v59 = vmul.f32 %v1069_v31, %v138_v63  ;;  %v1072_v58 = vadd.f32 -0.13877685, %v180_v14  ;;  %v366_v29 = vand.u32 2147483647, %v1571_v62  ;;  %v367_v14 = vand.u32 2147483647, %v1575_v0 }
  0x63   :  { %v331_v25 = vadd.f32 %v1172_v15, %v330_v46  ;;  %v1176_v28 = vpop.eup %1175  ;;  %v146_v33 = vmul.f32 %v138_v63, %v135_v45  ;;  %v368_v3 = vand.u32 2147483647, %v1578_v1  ;;  %v145_v53 = vadd.f32 %v137_v61, %v135_v45 }
  0x64   :  { %v142_v39 = vadd.f32 0.19977711, %v141_v59  ;;  %v182_v7 = vmul.f32 %v1072_v58, %v179_v8  ;;  %v2309_v58 = vand.u32 2147483647, %v1535_v32  ;;  %v2310_v54 = vand.u32 2147483647, %v1552_v43  ;;  %v1178_v46 = vpop.eup %1177 }
  0x65   :  { %v332_v34 = vadd.f32 %v1174_v55, %v331_v25  ;;  %v187_v62 = vmul.f32 %v179_v8, %v1691_v35  ;;  %1185 = vpow2.f32 %v320_v12  ;;  %v370_v11 = vand.u32 2147483647, %v1594_v18 }
  0x66   :  { %v143_v38 = vmul.f32 %v142_v39, %v138_v63  ;;  %v183_v21 = vadd.f32 0.19977711, %v182_v7  ;;  %v376_v59 = vsub.f32 1.0, %v2309_v58  ;;  %v377_v15 = vsub.f32 1.0, %v2310_v54 }
  0x67   :  { %v333_v0 = vadd.f32 %v1176_v28, %v332_v34  ;;  %v369_v63 = vand.u32 2147483647, %v1581_v9  ;;  %v2311_v1 = vand.u32 2147483647, %v1555_v6  ;;  %v1180_v61 = vpop.eup %1179  ;;  %v186_v43 = vadd.f32 %v178_v5, %v1691_v35 }
  0x68   :  { %v1070_v60 = vadd.f32 -0.3333295, %v143_v38  ;;  %v184_v31 = vmul.f32 %v183_v21, %v179_v8  ;;  %v371_v39 = vand.u32 2147483647, %v1597_v19  ;;  %v379_v25 = vsub.f32 1.0, %v363_v30 }
  0x69   :  { %v378_v45 = vsub.f32 1.0, %v2311_v1  ;;  %v334_v7 = vadd.f32 %v1178_v46, %v333_v0  ;;  %v392_v38 = vmax.f32 %v376_v59, 0.0  ;;  %v393_v8 = vmax.f32 %v377_v15, 0.0  ;;  %v1182_v12 = vpop.eup %1181  ;;  %v1745_v1 = vld [vmem:[#allocation5 + $0x98] sm:$0xff] }
  0x6a   :  { %v147_v32 = vmul.f32 %v1070_v60, %v146_v33  ;;  %v1073_v55 = vadd.f32 -0.3333295, %v184_v31  ;;  %1187 = vpow2.f32 %v322_v2  ;;  %v380_v34 = vsub.f32 1.0, %v364_v17  ;;  %v1184_v60 = vpop.eup %1183  ;;  %v1741_v2 = vld [vmem:[#allocation5 + $0x90] sm:$0xff] }
  0x6b   :  { %v335_v58 = vadd.f32 %v1180_v61, %v334_v7  ;;  %v372_v6 = vand.u32 2147483647, %v1600_v20  ;;  %v373_v54 = vand.u32 2147483647, %v1603_v22  ;;  %v394_v33 = vmax.f32 %v378_v45, 0.0  ;;  %v1753_v61 = vld [vmem:[#allocation5 + $0xc0] sm:$0xff] }
  0x6c   :  { %v148_v28 = vadd.f32 %v147_v32, %v145_v53  ;;  %v188_v21 = vmul.f32 %v1073_v55, %v187_v62  ;;  %v381_v31 = vsub.f32 1.0, %v365_v37  ;;  %v382_v46 = vsub.f32 1.0, %v366_v29  ;;  %v1749_v37 = vld [vmem:[#allocation5 + $0xb8] sm:$0xff]  ;;  %v1755_v32 = vld [vmem:[#allocation5 + $0xc8] sm:$0xff]  ;;  %v1757_v7 = vld [vmem:[#allocation5 + $0xd0] sm:$0xff] }
  0x6d   :  { %v336_v30 = vadd.f32 %v1182_v12, %v335_v58  ;;  %v395_v59 = vmax.f32 %v379_v25, 0.0  ;;  %v408_v15 = vmul.f32 %v392_v38, %v1479_v41  ;;  %v409_v53 = vmul.f32 %v393_v8, %v1484_v47  ;;  %v1759_v25 = vld [vmem:[#allocation5 + $0xd8] sm:$0xff] }
  0x6e   :  { %v149_v35 = vmul.f32 %v148_v28, %v1648_v4  ;;  %v189_v5 = vadd.f32 %v188_v21, %v186_v43  ;;  %1189 = vpow2.f32 %v324_v26  ;;  %v374_v62 = vand.u32 2147483647, %v1606_v23  ;;  %v1747_v4 = vld [vmem:[#allocation5 + $0xb0] sm:$0xff] }
  0x6f   :  { %v396_v0 = vmax.f32 %v380_v34, 0.0  ;;  %v337_v29 = vadd.f32 %v1184_v60, %v336_v30  ;;  %v375_v45 = vand.u32 2147483647, %v1609_v24  ;;  %v383_v41 = vsub.f32 1.0, %v367_v14  ;;  %v1762_v24 = vld [vmem:[#allocation5 + $0xe0] sm:$0xff]  ;;  %v1764_v14 = vld [vmem:[#allocation5 + $0xe8] sm:$0xff] }
  0x70   :  { %v190_v17 = vmul.f32 %v189_v5, %v1665_v13  ;;  %v410_v47 = vmul.f32 %v394_v33, %v1486_v48  ;;  %v1186_v13 = vpop.eup %1185  ;;  %v384_v23 = vsub.f32 1.0, %v368_v3  ;;  %v397_v55 = vmax.f32 %v381_v31, 0.0  ;;  %v1771_v21 = vld [vmem:[#allocation5 + $0xf0] sm:$0xff]  ;;  %v1773_v34 = vld [vmem:[#allocation5 + $0xf8] sm:$0xff] }
  0x71   :  { %v398_v43 = vmax.f32 %v382_v46, 0.0  ;;  %v411_v38 = vmul.f32 %v395_v59, %v1490_v50  ;;  %v424_v8 = vadd.f32 %v409_v53, %v408_v15  ;;  %v459_v48 = vmax.f32 %v1741_v2, %v1747_v4 }
  0x72   :  { %v191_v26 = vsub.f32 %v149_v35, %v190_v17  ;;  %v460_v12 = vmax.f32 %v1745_v1, %v1749_v37  ;;  %v412_v28 = vmul.f32 %v396_v0, %v1481_v42  ;;  %v2312_v50 = vmax.f32 %v1697_v10, %v1703_v40 }
  0x73   :  { %v2313_v33 = vmax.f32 %v1699_v27, %v1705_v36  ;;  %v338_v35 = vadd.f32 %v1186_v13, %v337_v29  ;;  %v425_v5 = vadd.f32 %v424_v8, %v410_v47  ;;  %v463_v31 = vmax.f32 %v459_v48, %v1757_v7 }
  0x74   :  { %v192_v3 = vmul.f32 0.40528473, %v191_v26  ;;  %v461_v58 = vmax.f32 %v2312_v50, %v1753_v61  ;;  %v464_v42 = vmax.f32 %v460_v12, %v1759_v25  ;;  %v1188_v46 = vpop.eup %1187  ;;  %v399_v59 = vmax.f32 %v383_v41, 0.0 }
  0x75   :  { %v462_v60 = vmax.f32 %v2313_v33, %v1755_v32  ;;  %v413_v17 = vmul.f32 %v397_v55, %v1488_v49  ;;  %v426_v0 = vadd.f32 %v425_v5, %v411_v38  ;;  %v467_v50 = vmax.f32 %v463_v31, %v1771_v21 }
  0x76   :  { %v1785_v30 = vmul.f32 %v192_v3, %v191_v26  ;;  %v465_v15 = vmax.f32 %v461_v58, %v1762_v24  ;;  %v468_v29 = vmax.f32 %v464_v42, %v1773_v34  ;;  %v385_v13 = vsub.f32 1.0, %v369_v63 }
  0x77   :  { %v466_v53 = vmax.f32 %v462_v60, %v1764_v14  ;;  %v400_v26 = vmax.f32 %v384_v23, 0.0  ;;  %v339_v41 = vadd.f32 %v1188_v46, %v338_v35  ;;  %v414_v48 = vmul.f32 %v398_v43, %v1492_v51 }
  0x78   :  { %v194_v47 = vsub.f32 %v1785_v30, %v1661_v44  ;;  %v427_v12 = vadd.f32 %v426_v0, %v412_v28  ;;  %v470_v3 = vmax.f32 %v467_v50, %v468_v29  ;;  %v1190_v58 = vpop.eup %1189  ;;  %v386_v55 = vsub.f32 1.0, %v370_v11 }
  0x79   :  { %v469_v8 = vmax.f32 %v465_v15, %v466_v53  ;;  %v387_v38 = vsub.f32 1.0, %v371_v39  ;;  %v388_v33 = vsub.f32 1.0, %v372_v6  ;;  %v389_v9 = vsub.f32 1.0, %v373_v54  ;;  %v2315_v39 = vld [vmem:[#allocation19_spill] sm:$0xff] }
  0x7a   :  { %v195_v49 = vadd.f32 1.0000001, %v194_v47  ;;  %v415_v63 = vmul.f32 %v399_v59, %v1494_v52  ;;  %v428_v23 = vadd.f32 %v427_v12, %v413_v17  ;;  %v390_v43 = vsub.f32 1.0, %v374_v62  ;;  %v2316_v47 = vld [vmem:[#allocation20_spill] sm:$0xff] }
  0x7b   :  { %v1806_v51 = vmax.f32 %v469_v8, %v470_v3  ;;  %v391_v28 = vsub.f32 1.0, %v375_v45  ;;  %v401_v60 = vmax.f32 %v385_v13, 0.0  ;;  %v340_v18 = vadd.f32 %v1190_v58, %v339_v41  ;;  %v2319_v41 = vld [vmem:[#allocation15_spill] sm:$0xff]  ;;  %v2320_v58 = vld [vmem:[#allocation16_spill] sm:$0xff] }
  0x7c   :  { %1191 = vrcp.f32 %v195_v49  ;;  %v416_v11 = vmul.f32 %v400_v26, %v1498_v56  ;;  %v429_v19 = vadd.f32 %v428_v23, %v414_v48  ;;  %v1812_v6 = vmin.f32 %v2315_v39, 14.99  ;;  %v2318_v26 = vld [vmem:[#allocation14_spill] sm:$0xff] }
  0x7d   :  { %2314 = vst [vmem:[#allocation23_spill] sm:$0xff] %v1806_v51  ;;  %v472_v20 = vsub.f32 %v1697_v10, %v1806_v51  ;;  %v473_v52 = vsub.f32 %v1699_v27, %v1806_v51  ;;  %v474_v22 = vsub.f32 %v1741_v2, %v1806_v51  ;;  %v475_v54 = vsub.f32 %v1745_v1, %v1806_v51 }
  0x7e   :  { %v402_v62 = vmax.f32 %v386_v55, 0.0  ;;  %v403_v45 = vmax.f32 %v387_v38, 0.0  ;;  %v404_v35 = vmax.f32 %v388_v33, 0.0  ;;  %v430_v56 = vadd.f32 %v429_v19, %v415_v63  ;;  %v2321_v38 = vld [vmem:[#allocation17_spill] sm:$0xff] }
  0x7f   :  { %v405_v5 = vmax.f32 %v389_v9, 0.0  ;;  %v406_v31 = vmax.f32 %v390_v43, 0.0  ;;  %v417_v42 = vmul.f32 %v401_v60, %v1500_v57  ;;  %v476_v46 = vsub.f32 %v1703_v40, %v1806_v51  ;;  %v2322_v9 = vld [vmem:[#allocation18_spill] sm:$0xff] }
  0x80   :  { %1193 = vlog2.f32 %v340_v18  ;;  %v407_v59 = vmax.f32 %v391_v28, 0.0  ;;  %v431_v15 = vadd.f32 %v430_v56, %v416_v11  ;;  %v488_v53 = vmul.f32 1.442695, %v472_v20 }
  0x81   :  { %v477_v17 = vsub.f32 %v1705_v36, %v1806_v51  ;;  %v490_v0 = vmul.f32 1.442695, %v473_v52  ;;  %v492_v50 = vmul.f32 1.442695, %v474_v22  ;;  %v494_v29 = vmul.f32 1.442695, %v475_v54 }
  0x82   :  { %v1826_v13 = vmin.f32 %v2316_v47, 14.99  ;;  %v418_v8 = vmul.f32 %v402_v62, %v2318_v26  ;;  %v419_v57 = vmul.f32 %v403_v45, %v2319_v41  ;;  %1195 = vpow2.f32 %v488_v53 }
  0x83   :  { %v432_v48 = vadd.f32 %v431_v15, %v417_v42  ;;  %v478_v12 = vsub.f32 %v1747_v4, %v1806_v51  ;;  %1197 = vpow2.f32 %v490_v0  ;;  %v496_v3 = vmul.f32 1.442695, %v476_v46 }
  0x84   :  { %2317 = vst [vmem:[#allocation19_spill] sm:$0xff] %v1826_v13  ;;  %v420_v55 = vmul.f32 %v404_v35, %v2320_v58  ;;  %v1834_v33 = vmul.f32 %v405_v5, %v2321_v38  ;;  %v1837_v63 = vmul.f32 %v406_v31, %v2322_v9  ;;  %1199 = vpow2.f32 %v492_v50 }
  0x85   :  { %v1840_v43 = vmul.f32 %v407_v59, %v1523_v16  ;;  %v479_v28 = vsub.f32 %v1749_v37, %v1806_v51  ;;  %1201 = vpow2.f32 %v494_v29  ;;  %v498_v60 = vmul.f32 1.442695, %v477_v17 }
  0x86   :  { %v1192_v23 = vpop.eup %1191  ;;  %v1845_v11 = vadd.f32 -1.0, %v1812_v6  ;;  %v1848_v19 = vadd.f32 -2.0, %v1812_v6  ;;  %v1851_v20 = vadd.f32 -3.0, %v1812_v6  ;;  %v433_v39 = vadd.f32 %v432_v48, %v418_v8 }
  0x87   :  { %v197_v18 = vmul.f32 %v1192_v23, %v195_v49  ;;  %v480_v16 = vsub.f32 %v1753_v61, %v1806_v51  ;;  %1203 = vpow2.f32 %v496_v3  ;;  %v500_v52 = vmul.f32 1.442695, %v478_v12 }
  0x88   :  { %v1856_v54 = vadd.f32 -4.0, %v1812_v6  ;;  %v1859_v49 = vadd.f32 -5.0, %v1812_v6  ;;  %v1862_v62 = vadd.f32 -6.0, %v1812_v6  ;;  %v481_v45 = vsub.f32 %v1755_v32, %v1806_v51 }
  0x89   :  { %v198_v22 = vsub.f32 2.0, %v197_v18  ;;  %1205 = vpow2.f32 %v498_v60  ;;  %v502_v35 = vmul.f32 1.442695, %v479_v28  ;;  %v1867_v56 = vadd.f32 -7.0, %v1812_v6  ;;  %v1901_v28 = vld [vmem:[#allocation5 + $0x120] sm:$0xff] }
  0x8a   :  { %v1194_v5 = vpop.eup %1193  ;;  %v1870_v42 = vadd.f32 -8.0, %v1812_v6  ;;  %v1873_v46 = vadd.f32 -9.0, %v1812_v6  ;;  %v1876_v59 = vadd.f32 -10.0, %v1812_v6  ;;  %v434_v15 = vadd.f32 %v433_v39, %v419_v57 }
  0x8b   :  { %v199_v31 = vmul.f32 %v1192_v23, %v198_v22  ;;  %v482_v53 = vsub.f32 %v1757_v7, %v1806_v51  ;;  %1207 = vpow2.f32 %v500_v52  ;;  %v504_v17 = vmul.f32 1.442695, %v480_v16  ;;  %v1899_v23 = vld [vmem:[#allocation5 + $0x100] sm:$0xff] }
  0x8c   :  { %v1196_v0 = vpop.eup %1195  ;;  %v1882_v29 = vadd.f32 -11.0, %v1812_v6  ;;  %v1885_v47 = vadd.f32 -12.0, %v1812_v6  ;;  %v1888_v26 = vadd.f32 -13.0, %v1812_v6  ;;  %v483_v41 = vsub.f32 %v1759_v25, %v1806_v51  ;;  %v2323_v52 = vld [vmem:[#allocation22_spill] sm:$0xff] }
  0x8d   :  { %v200_v50 = vmul.f32 %v199_v31, %v1785_v30  ;;  %v1198_v8 = vpop.eup %1197  ;;  %v484_v57 = vsub.f32 %v1762_v24, %v1806_v51  ;;  %1209 = vpow2.f32 %v502_v35  ;;  %v506_v48 = vmul.f32 1.442695, %v481_v45 }
  0x8e   :  { %v1200_v12 = vpop.eup %1199  ;;  %v485_v58 = vsub.f32 %v1764_v14, %v1806_v51  ;;  %v486_v38 = vsub.f32 %v1771_v21, %v1806_v51  ;;  %v520_v9 = vadd.f32 %v1198_v8, %v1196_v0  ;;  %v435_v18 = vadd.f32 %v434_v15, %v420_v55 }
  0x8f   :  { %v206_v3 = vmul.f32 %v200_v50, %v1785_v30  ;;  %v1202_v60 = vpop.eup %1201  ;;  %v487_v39 = vsub.f32 %v1773_v34, %v1806_v51  ;;  %1211 = vpow2.f32 %v504_v17  ;;  %v508_v16 = vmul.f32 1.442695, %v482_v53 }
  0x90   :  { %v521_v22 = vadd.f32 %v1200_v12, %v520_v9  ;;  %v554_v45 = vand.u32 2147483647, %v1812_v6  ;;  %v555_v35 = vand.u32 2147483647, %v1845_v11  ;;  %v1908_v0 = vmul.f32 0.6931472, %v1194_v5 }
  0x91   :  { %v207_v30 = vadd.f32 %v206_v3, %v2323_v52  ;;  %v1204_v31 = vpop.eup %1203  ;;  %1213 = vpow2.f32 %v506_v48  ;;  %v510_v50 = vmul.f32 1.442695, %v483_v41  ;;  %v512_v8 = vmul.f32 1.442695, %v484_v57  ;;  %v63_v12 = vld [vmem:[#allocation2 + $0x50] sm:$0xff] }
  0x92   :  { %v522_v17 = vadd.f32 %v1202_v60, %v521_v22  ;;  %v556_v53 = vand.u32 2147483647, %v1848_v19  ;;  %v436_v9 = vadd.f32 %v435_v18, %v1834_v33  ;;  %1215 = vpow2.f32 %v508_v16 }
  0x93   :  { %v208_v15 = vsub.f32 %v1661_v44, %v207_v30  ;;  %v1206_v3 = vpop.eup %1205  ;;  %v514_v11 = vmul.f32 1.442695, %v485_v58  ;;  %v557_v5 = vand.u32 2147483647, %v1851_v20  ;;  %v570_v41 = vsub.f32 1.0, %v554_v45 }
  0x94   :  { %v523_v48 = vadd.f32 %v1204_v31, %v522_v17  ;;  %v571_v51 = vsub.f32 1.0, %v555_v35  ;;  %1217 = vpow2.f32 %v510_v50  ;;  %v516_v55 = vmul.f32 1.442695, %v486_v38 }
  0x95   :  { %v209_v52 = vsub.f32 1.0, %v208_v15  ;;  %v1208_v13 = vpop.eup %1207  ;;  %v518_v44 = vmul.f32 1.442695, %v487_v39  ;;  %v1917_v57 = vadd.f32 -14.0, %v1812_v6  ;;  %v558_v30 = vand.u32 2147483647, %v1856_v54 }
  0x96   :  { %v524_v60 = vadd.f32 %v1206_v3, %v523_v48  ;;  %v572_v33 = vsub.f32 1.0, %v556_v53  ;;  %v1921_v58 = vadd.f32 %v436_v9, %v1837_v63  ;;  %1219 = vpow2.f32 %v512_v8  ;;  %v1941_v9 = vld [vmem:[#allocation5 + $0x128] sm:$0xff] }
  0x97   :  { %v210_v19 = vmul.f32 %v209_v52, %v63_v12  ;;  %v1210_v18 = vpop.eup %1209  ;;  %v1924_v20 = vadd.f32 -15.0, %v1812_v6  ;;  %v559_v16 = vand.u32 2147483647, %v1859_v49  ;;  %v573_v39 = vsub.f32 1.0, %v557_v5  ;;  %v1935_v12 = vld [vmem:[#allocation5 + $0x108] sm:$0xff] }
  0x98   :  { %v525_v38 = vadd.f32 %v1208_v13, %v524_v60  ;;  %v586_v22 = vmax.f32 %v570_v41, 0.0  ;;  %v587_v45 = vmax.f32 %v571_v51, 0.0  ;;  %1221 = vpow2.f32 %v514_v11  ;;  %v1947_v41 = vld [vmem:[#allocation5 + $0x130] sm:$0xff]  ;;  %v1951_v60 = vld [vmem:[#allocation5 + $0x140] sm:$0xff] }
  0x99   :  { %211 = vadd.xlane.f32.xlu0 %v210_v19  ;;  %v1212_v35 = vpop.eup %1211  ;;  %v560_v54 = vand.u32 2147483647, %v1862_v62  ;;  %v561_v31 = vand.u32 2147483647, %v1867_v56  ;;  %v562_v63 = vand.u32 2147483647, %v1870_v42  ;;  %1223 = vpow2.f32 %v516_v55 }
  0x9a   :  { %v526_v50 = vadd.f32 %v1210_v18, %v525_v38  ;;  %v563_v15 = vand.u32 2147483647, %v1873_v46  ;;  %v574_v6 = vsub.f32 1.0, %v558_v30  ;;  %v588_v8 = vmax.f32 %v572_v33, 0.0  ;;  %v1937_v42 = vld [vmem:[#allocation5 + $0x110] sm:$0xff]  ;;  %v1939_v46 = vld [vmem:[#allocation5 + $0x118] sm:$0xff] }
  0x9b   :  { %v1214_v17 = vpop.eup %1213  ;;  %v564_v13 = vand.u32 2147483647, %v1876_v59  ;;  %v575_v51 = vsub.f32 1.0, %v559_v16  ;;  %v589_v3 = vmax.f32 %v573_v39, 0.0  ;;  %v602_v62 = vmul.f32 %v586_v22, %v1697_v10  ;;  %v1949_v19 = vld [vmem:[#allocation5 + $0x138] sm:$0xff] }
  0x9c   :  { %v527_v53 = vadd.f32 %v1212_v35, %v526_v50  ;;  %v603_v56 = vmul.f32 %v587_v45, %v1699_v27  ;;  %v1216_v55 = vpop.eup %1215  ;;  %1225 = vpow2.f32 %v518_v44  ;;  %v566_v59 = vand.u32 2147483647, %v1885_v47  ;;  %v1959_v22 = vld [vmem:[#allocation5 + $0x158] sm:$0xff]  ;;  %v1961_v45 = vld [vmem:[#allocation5 + $0x160] sm:$0xff] }
  0x9d   :  { %v567_v11 = vand.u32 2147483647, %v1888_v26  ;;  %v568_v5 = vand.u32 2147483647, %v1917_v57  ;;  %v576_v10 = vsub.f32 1.0, %v560_v54  ;;  %v590_v48 = vmax.f32 %v574_v6, 0.0 }
  0x9e   :  { %v528_v52 = vadd.f32 %v1214_v17, %v527_v53  ;;  %v604_v27 = vmul.f32 %v588_v8, %v1741_v2  ;;  %v1218_v30 = vpop.eup %1217  ;;  %v569_v44 = vand.u32 2147483647, %v1924_v20  ;;  %v577_v33 = vsub.f32 1.0, %v561_v31  ;;  %v1954_v26 = vld [vmem:[#allocation5 + $0x148] sm:$0xff]  ;;  %v1957_v2 = vld [vmem:[#allocation5 + $0x150] sm:$0xff]  ;;  %2325 = vst [vmem:[#allocation14_spill] sm:$0xff] %v1959_v22 }
  0x9f   :  { %v578_v47 = vsub.f32 1.0, %v562_v63  ;;  %v579_v18 = vsub.f32 1.0, %v563_v15  ;;  %2324 = vst [vmem:[#allocation20_spill] sm:$0xff] %v1954_v26  ;;  %v591_v16 = vmax.f32 %v575_v51, 0.0  ;;  %v605_v38 = vmul.f32 %v589_v3, %v1745_v1  ;;  %v1974_v17 = vld [vmem:[#allocation5 + $0x168] sm:$0xff]  ;;  %v1976_v51 = vld [vmem:[#allocation5 + $0x170] sm:$0xff] }
  0xa0   :  { %v529_v57 = vadd.f32 %v1216_v55, %v528_v52  ;;  %v618_v39 = vadd.f32 %v603_v56, %v602_v62  ;;  %v1220_v35 = vpop.eup %1219  ;;  %v653_v20 = vmax.f32 %v1935_v12, %v1941_v9  ;;  %v654_v54 = vmax.f32 %v1937_v42, %v1947_v41  ;;  %v1978_v53 = vld [vmem:[#allocation5 + $0x178] sm:$0xff] }
  0xa1   :  { %v655_v31 = vmax.f32 %v1939_v46, %v1949_v19  ;;  %v2326_v1 = vmax.f32 %v1899_v23, %v1901_v28  ;;  %v592_v15 = vmax.f32 %v576_v10, 0.0  ;;  %v606_v6 = vmul.f32 %v590_v48, %v1703_v40 }
  0xa2   :  { %v530_v50 = vadd.f32 %v1218_v30, %v529_v57  ;;  %v619_v8 = vadd.f32 %v618_v39, %v604_v27  ;;  %v1222_v3 = vpop.eup %1221  ;;  %v657_v62 = vmax.f32 %v653_v20, %v1954_v26  ;;  %v658_v56 = vmax.f32 %v654_v54, %v1957_v2 }
  0xa3   :  { %v656_v63 = vmax.f32 %v2326_v1, %v1951_v60  ;;  %v659_v55 = vmax.f32 %v655_v31, %v1959_v22  ;;  %v593_v10 = vmax.f32 %v577_v33, 0.0  ;;  %v607_v40 = vmul.f32 %v591_v16, %v1705_v36  ;;  %v1224_v27 = vpop.eup %1223 }
  0xa4   :  { %v531_v30 = vadd.f32 %v1220_v35, %v530_v50  ;;  %v620_v48 = vadd.f32 %v619_v8, %v605_v38  ;;  %v580_v57 = vsub.f32 1.0, %v564_v13  ;;  %v661_v39 = vmax.f32 %v657_v62, %v1974_v17 }
  0xa5   :  { %v660_v52 = vmax.f32 %v656_v63, %v1961_v45  ;;  %v662_v1 = vmax.f32 %v658_v56, %v1976_v51  ;;  %v663_v49 = vmax.f32 %v659_v55, %v1978_v53  ;;  %v594_v26 = vmax.f32 %v578_v47, 0.0 }
  0xa6   :  { %v532_v20 = vadd.f32 %v1222_v3, %v531_v30  ;;  %v608_v54 = vmul.f32 %v592_v15, %v1747_v4  ;;  %v621_v31 = vadd.f32 %v620_v48, %v606_v6  ;;  %v1226_v22 = vpop.eup %1225  ;;  %v2327_v35 = vand.u32 2147483647, %v1882_v29 }
  0xa7   :  { %v595_v63 = vmax.f32 %v579_v18, 0.0  ;;  %v664_v36 = vmax.f32 %v660_v52, %v661_v39  ;;  %v665_v16 = vmax.f32 %v662_v1, %v663_v49  ;;  %v582_v13 = vsub.f32 1.0, %v566_v59 }
  0xa8   :  { %v581_v33 = vsub.f32 1.0, %v2327_v35  ;;  %v533_v38 = vadd.f32 %v1224_v27, %v532_v20  ;;  %v609_v50 = vmul.f32 %v593_v10, %v1749_v37  ;;  %v622_v8 = vadd.f32 %v621_v31, %v607_v40 }
  0xa9   :  { %v583_v62 = vsub.f32 1.0, %v567_v11  ;;  %v584_v56 = vsub.f32 1.0, %v568_v5  ;;  %v585_v55 = vsub.f32 1.0, %v569_v44  ;;  %v1992_v3 = vmax.f32 %v664_v36, %v665_v16  ;;  %v2328_v44 = vld [vmem:[#allocation21_spill] sm:$0xff]  ;;  %v2329_v36 = vld [vmem:[#allocation19_spill] sm:$0xff] }
  0xaa   :  { %v534_v47 = vadd.f32 %v1226_v22, %v533_v38  ;;  %v596_v4 = vmax.f32 %v580_v57, 0.0  ;;  %v610_v15 = vmul.f32 %v594_v26, %v1753_v61  ;;  %v623_v6 = vadd.f32 %v622_v8, %v608_v54 }
  0xab   :  { %v597_v29 = vmax.f32 %v581_v33, 0.0  ;;  %v611_v18 = vmul.f32 %v595_v63, %v1755_v32  ;;  %v667_v49 = vsub.f32 %v1899_v23, %v1992_v3  ;;  %v668_v37 = vsub.f32 %v1935_v12, %v1992_v3 }
  0xac   :  { %1227 = vlog2.f32 %v534_v47  ;;  %v624_v59 = vadd.f32 %v623_v6, %v609_v50  ;;  %v669_v11 = vsub.f32 %v1937_v42, %v1992_v3  ;;  %v670_v5 = vsub.f32 %v1939_v46, %v1992_v3 }
  0xad   :  { %v2006_v61 = vadd.f32 %v1908_v0, %v2328_v44  ;;  %v2010_v32 = vadd.f32 %v1921_v58, %v1840_v43  ;;  %v598_v26 = vmax.f32 %v582_v13, 0.0  ;;  %v599_v22 = vmax.f32 %v583_v62, 0.0 }
  0xae   :  { %v600_v52 = vmax.f32 %v584_v56, 0.0  ;;  %v612_v30 = vmul.f32 %v596_v4, %v1757_v7  ;;  %v625_v10 = vadd.f32 %v624_v59, %v610_v15  ;;  %v671_v40 = vsub.f32 %v1901_v28, %v1992_v3 }
  0xaf   :  { %v601_v48 = vmax.f32 %v585_v55, 0.0  ;;  %v613_v27 = vmul.f32 %v597_v29, %v1759_v25  ;;  %v672_v0 = vsub.f32 %v1941_v9, %v1992_v3  ;;  %v683_v57 = vmul.f32 1.442695, %v667_v49 }
  0xb0   :  { %v626_v39 = vadd.f32 %v625_v10, %v611_v18  ;;  %v685_v1 = vmul.f32 1.442695, %v668_v37  ;;  %v687_v43 = vmul.f32 1.442695, %v669_v11  ;;  %v689_v58 = vmul.f32 1.442695, %v670_v5 }
  0xb1   :  { %v439_v20 = vsub.f32 %v2006_v61, %v2010_v32  ;;  %v614_v7 = vmul.f32 %v598_v26, %v1762_v24  ;;  %v615_v54 = vmul.f32 %v599_v22, %v1764_v14  ;;  %1229 = vpow2.f32 %v683_v57  ;;  %v2330_v18 = vld [vmem:[#allocation20_spill] sm:$0xff]  ;;  %v2331_v26 = vld [vmem:[#allocation23_spill] sm:$0xff] }
  0xb2   :  { %v627_v31 = vadd.f32 %v626_v39, %v612_v30  ;;  %v673_v25 = vsub.f32 %v1947_v41, %v1992_v3  ;;  %1231 = vpow2.f32 %v685_v1  ;;  %v691_v35 = vmul.f32 1.442695, %v671_v40  ;;  %v2332_v40 = vld [vmem:[#allocation14_spill] sm:$0xff] }
  0xb3   :  { %v616_v33 = vmul.f32 %v600_v52, %v1771_v21  ;;  %v617_v63 = vmul.f32 %v601_v48, %v1773_v34  ;;  %1233 = vpow2.f32 %v687_v43  ;;  %v1104_v16 = vadd.f32 -1.0, %v2329_v36 }
  0xb4   :  { %v628_v38 = vadd.f32 %v627_v31, %v613_v27  ;;  %v674_v24 = vsub.f32 %v1949_v19, %v1992_v3  ;;  %1235 = vpow2.f32 %v689_v58  ;;  %v693_v14 = vmul.f32 1.442695, %v672_v0 }
  0xb5   :  { %v1105_v13 = vadd.f32 -2.0, %v2329_v36  ;;  %v2031_v50 = vadd.f32 -3.0, %v2329_v36  ;;  %v2034_v8 = vadd.f32 -4.0, %v2329_v36  ;;  %v2037_v21 = vadd.f32 -5.0, %v2329_v36 }
  0xb6   :  { %v1228_v34 = vpop.eup %1227  ;;  %v629_v62 = vadd.f32 %v628_v38, %v614_v7  ;;  %v675_v56 = vsub.f32 %v1951_v60, %v1992_v3  ;;  %1237 = vpow2.f32 %v691_v35  ;;  %v695_v55 = vmul.f32 1.442695, %v673_v25 }
  0xb7   :  { %v536_v47 = vmul.f32 0.6931472, %v1228_v34  ;;  %v2042_v4 = vadd.f32 -6.0, %v2329_v36  ;;  %v2045_v15 = vadd.f32 -7.0, %v2329_v36  ;;  %v2048_v6 = vadd.f32 -8.0, %v2329_v36 }
  0xb8   :  { %v630_v29 = vadd.f32 %v629_v62, %v615_v54  ;;  %v676_v49 = vsub.f32 %v2330_v18, %v1992_v3  ;;  %1239 = vpow2.f32 %v693_v14  ;;  %v697_v37 = vmul.f32 1.442695, %v674_v24 }
  0xb9   :  { %v677_v59 = vsub.f32 %v1957_v2, %v1992_v3  ;;  %v2055_v11 = vadd.f32 -9.0, %v2329_v36  ;;  %v2058_v5 = vadd.f32 -10.0, %v2329_v36  ;;  %v2061_v44 = vadd.f32 -11.0, %v2329_v36 }
  0xba   :  { %v537_v22 = vadd.f32 %v536_v47, %v2331_v26  ;;  %v631_v52 = vadd.f32 %v630_v29, %v616_v33  ;;  %1241 = vpow2.f32 %v695_v55  ;;  %v699_v30 = vmul.f32 1.442695, %v675_v56 }
  0xbb   :  { %v1230_v10 = vpop.eup %1229  ;;  %v678_v48 = vsub.f32 %v2332_v40, %v1992_v3  ;;  %v2067_v27 = vadd.f32 -12.0, %v2329_v36  ;;  %v2070_v0 = vadd.f32 -13.0, %v2329_v36  ;;  %v749_v57 = vand.u32 2147483647, %v2329_v36 }
  0xbc   :  { %v1232_v39 = vpop.eup %1231  ;;  %v632_v1 = vadd.f32 %v631_v52, %v617_v63  ;;  %1243 = vpow2.f32 %v697_v37  ;;  %v701_v43 = vmul.f32 1.442695, %v676_v49  ;;  %v750_v58 = vand.u32 2147483647, %v1104_v16 }
  0xbd   :  { %v1234_v7 = vpop.eup %1233  ;;  %v679_v54 = vsub.f32 %v1961_v45, %v1992_v3  ;;  %v680_v31 = vsub.f32 %v1974_v17, %v1992_v3  ;;  %v681_v25 = vsub.f32 %v1976_v51, %v1992_v3  ;;  %v715_v35 = vadd.f32 %v1232_v39, %v1230_v10 }
  0xbe   :  { %v1236_v33 = vpop.eup %1235  ;;  %v633_v38 = vsub.f32 %v537_v22, %v632_v1  ;;  %1245 = vpow2.f32 %v699_v30  ;;  %v703_v24 = vmul.f32 1.442695, %v677_v59  ;;  %v751_v14 = vand.u32 2147483647, %v1105_v13 }
  0xbf   :  { %v682_v63 = vsub.f32 %v1978_v53, %v1992_v3  ;;  %v705_v16 = vmul.f32 1.442695, %v678_v48  ;;  %v716_v34 = vadd.f32 %v1234_v7, %v715_v35  ;;  %v752_v62 = vand.u32 2147483647, %v2031_v50 }
  0xc0   :  { %v1238_v56 = vpop.eup %1237  ;;  %v2085_v55 = vadd.f32 %v633_v38, %v439_v20  ;;  %1247 = vpow2.f32 %v701_v43  ;;  %v765_v47 = vsub.f32 1.0, %v749_v57  ;;  %v766_v29 = vsub.f32 1.0, %v750_v58 }
  0xc1   :  { %v707_v49 = vmul.f32 1.442695, %v679_v54  ;;  %v717_v37 = vadd.f32 %v1236_v33, %v716_v34  ;;  %v2088_v13 = vadd.f32 -14.0, %v2329_v36  ;;  %v2091_v59 = vadd.f32 -15.0, %v2329_v36  ;;  %v2110_v34 = vld [vmem:[#allocation5 + $0x1a0] sm:$0xff] }
  0xc2   :  { %2333 = vst [vmem:[#allocation15_spill] sm:$0xff] %v2085_v55  ;;  %v1240_v26 = vpop.eup %1239  ;;  %1249 = vpow2.f32 %v703_v24  ;;  %v709_v50 = vmul.f32 1.442695, %v680_v31  ;;  %v753_v22 = vand.u32 2147483647, %v2034_v8  ;;  %v767_v52 = vsub.f32 1.0, %v751_v14 }
  0xc3   :  { %v711_v61 = vmul.f32 1.442695, %v681_v25  ;;  %v713_v32 = vmul.f32 1.442695, %v682_v63  ;;  %v718_v20 = vadd.f32 %v1238_v56, %v717_v37  ;;  %v754_v30 = vand.u32 2147483647, %v2037_v21 }
  0xc4   :  { %v1242_v10 = vpop.eup %1241  ;;  %1251 = vpow2.f32 %v705_v16  ;;  %v768_v48 = vsub.f32 1.0, %v752_v62  ;;  %v781_v57 = vmax.f32 %v765_v47, 0.0  ;;  %v782_v39 = vmax.f32 %v766_v29, 0.0  ;;  %v2105_v14 = vld [vmem:[#allocation5 + $0x188] sm:$0xff]  ;;  %v2115_v29 = vld [vmem:[#allocation5 + $0x198] sm:$0xff] }
  0xc5   :  { %v719_v1 = vadd.f32 %v1240_v26, %v718_v20  ;;  %v755_v36 = vand.u32 2147483647, %v2042_v4  ;;  %v756_v43 = vand.u32 2147483647, %v2045_v15  ;;  %v757_v58 = vand.u32 2147483647, %v2048_v6 }
  0xc6   :  { %v1244_v7 = vpop.eup %1243  ;;  %1253 = vpow2.f32 %v707_v49  ;;  %v758_v8 = vand.u32 2147483647, %v2055_v11  ;;  %v769_v54 = vsub.f32 1.0, %v753_v22  ;;  %v783_v31 = vmax.f32 %v767_v52, 0.0  ;;  %v2103_v6 = vld [vmem:[#allocation5 + $0x180] sm:$0xff]  ;;  %v2112_v62 = vld [vmem:[#allocation5 + $0x1a8] sm:$0xff] }
  0xc7   :  { %v720_v25 = vadd.f32 %v1242_v10, %v719_v1  ;;  %v759_v21 = vand.u32 2147483647, %v2058_v5  ;;  %v770_v33 = vsub.f32 1.0, %v754_v30  ;;  %1255 = vpow2.f32 %v709_v50  ;;  %v2108_v5 = vld [vmem:[#allocation5 + $0x190] sm:$0xff]  ;;  %v2119_v37 = vld [vmem:[#allocation5 + $0x1b8] sm:$0xff]  ;;  %v2125_v20 = vld [vmem:[#allocation5 + $0x1c8] sm:$0xff] }
  0xc8   :  { %v1246_v38 = vpop.eup %1245  ;;  %v784_v24 = vmax.f32 %v768_v48, 0.0  ;;  %v797_v4 = vmul.f32 %v781_v57, %v1899_v23  ;;  %v798_v15 = vmul.f32 %v782_v39, %v1935_v12  ;;  %1257 = vpow2.f32 %v711_v61  ;;  %v2117_v49 = vld [vmem:[#allocation5 + $0x1b0] sm:$0xff]  ;;  %v2123_v61 = vld [vmem:[#allocation5 + $0x1c0] sm:$0xff]  ;;  %v2130_v48 = vld [vmem:[#allocation5 + $0x1d8] sm:$0xff] }
  0xc9   :  { %v721_v11 = vadd.f32 %v1244_v7, %v720_v25  ;;  %v771_v16 = vsub.f32 1.0, %v755_v36  ;;  %1259 = vpow2.f32 %v713_v32  ;;  %v772_v23 = vsub.f32 1.0, %v756_v43  ;;  %v2136_v43 = vld [vmem:[#allocation5 + $0x1e0] sm:$0xff]  ;;  %v2145_v25 = vld [vmem:[#allocation5 + $0x1f0] sm:$0xff] }
  0xca   :  { %v1248_v56 = vpop.eup %1247  ;;  %v785_v47 = vmax.f32 %v769_v54, 0.0  ;;  %v799_v12 = vmul.f32 %v783_v31, %v1937_v42  ;;  %v773_v50 = vsub.f32 1.0, %v757_v58  ;;  %v2121_v22 = vsub.f32 1.0, %v758_v8  ;;  %v2128_v42 = vld [vmem:[#allocation5 + $0x1d0] sm:$0xff]  ;;  %v2138_v58 = vld [vmem:[#allocation5 + $0x1e8] sm:$0xff] }
  0xcb   :  { %v722_v26 = vadd.f32 %v1246_v38, %v721_v11  ;;  %v786_v52 = vmax.f32 %v770_v33, 0.0  ;;  %v800_v30 = vmul.f32 %v784_v24, %v1939_v46  ;;  %v813_v10 = vadd.f32 %v798_v15, %v797_v4  ;;  %v2147_v33 = vld [vmem:[#allocation5 + $0x1f8] sm:$0xff] }
  0xcc   :  { %v1250_v32 = vpop.eup %1249  ;;  %v847_v57 = vmax.f32 %v2103_v6, %v2110_v34  ;;  %v848_v39 = vmax.f32 %v2105_v14, %v2112_v62  ;;  %v787_v36 = vmax.f32 %v771_v16, 0.0  ;;  %v849_v46 = vmax.f32 %v2108_v5, %v2117_v49 }
  0xcd   :  { %v723_v1 = vadd.f32 %v1248_v56, %v722_v26  ;;  %v850_v7 = vmax.f32 %v2115_v29, %v2119_v37  ;;  %v801_v54 = vmul.f32 %v785_v47, %v1901_v28  ;;  %v814_v31 = vadd.f32 %v813_v10, %v799_v12 }
  0xce   :  { %v1252_v8 = vpop.eup %1251  ;;  %v851_v38 = vmax.f32 %v847_v57, %v2123_v61  ;;  %v852_v24 = vmax.f32 %v848_v39, %v2125_v20  ;;  %v788_v15 = vmax.f32 %v772_v23, 0.0  ;;  %v853_v11 = vmax.f32 %v849_v46, %v2128_v42 }
  0xcf   :  { %v724_v4 = vadd.f32 %v1250_v32, %v723_v1  ;;  %v854_v16 = vmax.f32 %v850_v7, %v2130_v48  ;;  %v802_v26 = vmul.f32 %v786_v52, %v1941_v9  ;;  %v815_v63 = vadd.f32 %v814_v31, %v800_v30 }
  0xd0   :  { %v1254_v56 = vpop.eup %1253  ;;  %v855_v28 = vmax.f32 %v851_v38, %v2136_v43  ;;  %v856_v47 = vmax.f32 %v852_v24, %v2138_v58  ;;  %v775_v10 = vsub.f32 1.0, %v759_v21  ;;  %v857_v57 = vmax.f32 %v853_v11, %v2145_v25 }
  0xd1   :  { %v725_v12 = vadd.f32 %v1252_v8, %v724_v4  ;;  %v858_v39 = vmax.f32 %v854_v16, %v2147_v33  ;;  %v1256_v32 = vpop.eup %1255  ;;  %v789_v23 = vmax.f32 %v773_v50, 0.0  ;;  %v803_v1 = vmul.f32 %v787_v36, %v1947_v41  ;;  %v1297_v4 = vld [vmem:[#allocation2 + $0x38] sm:$0xff]  ;;  %v1298_v50 = vld [vmem:[#allocation2 + $0x48] sm:$0xff] }
  0xd2   :  { %v816_v46 = vadd.f32 %v815_v63, %v801_v54  ;;  %v859_v7 = vmax.f32 %v855_v28, %v856_v47  ;;  %v1258_v35 = vpop.eup %1257  ;;  %v762_v9 = vand.u32 2147483647, %v2070_v0  ;;  %v2334_v52 = vand.u32 2147483647, %v2061_v44 }
  0xd3   :  { %v726_v55 = vadd.f32 %v1254_v56, %v725_v12  ;;  %v860_v31 = vmax.f32 %v857_v57, %v858_v39  ;;  %v1260_v8 = vpop.eup %1259  ;;  %v790_v21 = vmax.f32 %v2121_v22, 0.0  ;;  %v804_v38 = vmul.f32 %v788_v15, %v1949_v19 }
  0xd4   :  { %v776_v30 = vsub.f32 1.0, %v2334_v52  ;;  %v817_v24 = vadd.f32 %v816_v46, %v802_v26  ;;  %v228_v11 = vsub.f32 %v1297_v4, %v1298_v50  ;;  %v763_v63 = vand.u32 2147483647, %v2088_v13 }
  0xd5   :  { %v727_v41 = vadd.f32 %v1256_v32, %v726_v55  ;;  %v2165_v36 = vmax.f32 %v859_v7, %v860_v31  ;;  %v2335_v0 = vand.u32 2147483647, %v2067_v27  ;;  %v791_v44 = vmax.f32 %v775_v10, 0.0 }
  0xd6   :  { %v805_v16 = vmul.f32 %v789_v23, %v1951_v60  ;;  %v818_v56 = vadd.f32 %v817_v24, %v803_v1  ;;  %v764_v22 = vand.u32 2147483647, %v2091_v59  ;;  %v778_v19 = vsub.f32 1.0, %v762_v9 }
  0xd7   :  { %v777_v54 = vsub.f32 1.0, %v2335_v0  ;;  %v728_v28 = vadd.f32 %v1258_v35, %v727_v41  ;;  %v792_v15 = vmax.f32 %v776_v30, 0.0  ;;  %v806_v26 = vmul.f32 %v790_v21, %v2330_v18 }
  0xd8   :  { %v819_v47 = vadd.f32 %v818_v56, %v804_v38  ;;  %v862_v55 = vsub.f32 %v2103_v6, %v2165_v36  ;;  %v863_v13 = vsub.f32 %v2105_v14, %v2165_v36  ;;  %v229_v27 = vmax.f32 %v228_v11, 0.0 }
  0xd9   :  { %v729_v12 = vadd.f32 %v1260_v8, %v728_v28  ;;  %v864_v60 = vsub.f32 %v2108_v5, %v2165_v36  ;;  %v865_v35 = vsub.f32 %v2115_v29, %v2165_v36  ;;  %v779_v59 = vsub.f32 1.0, %v763_v63 }
  0xda   :  { %v793_v10 = vmax.f32 %v777_v54, 0.0  ;;  %v807_v57 = vmul.f32 %v791_v44, %v1957_v2  ;;  %v820_v18 = vadd.f32 %v819_v47, %v805_v16  ;;  %v780_v39 = vsub.f32 1.0, %v764_v22 }
  0xdb   :  { %1261 = vlog2.f32 %v729_v12  ;;  %v794_v32 = vmax.f32 %v778_v19, 0.0  ;;  %v866_v23 = vsub.f32 %v2110_v34, %v2165_v36  ;;  %v808_v1 = vmul.f32 %v792_v15, %v2332_v40 }
  0xdc   :  { %v821_v46 = vadd.f32 %v820_v18, %v806_v26  ;;  %v878_v7 = vmul.f32 1.442695, %v862_v55  ;;  %v880_v9 = vmul.f32 1.442695, %v863_v13  ;;  %v867_v52 = vsub.f32 %v2112_v62, %v2165_v36 }
  0xdd   :  { %v882_v30 = vmul.f32 1.442695, %v864_v60  ;;  %v884_v31 = vmul.f32 1.442695, %v865_v35  ;;  %v795_v8 = vmax.f32 %v779_v59, 0.0  ;;  %v809_v2 = vmul.f32 %v793_v10, %v1961_v45 }
  0xde   :  { %v822_v21 = vadd.f32 %v821_v46, %v807_v57  ;;  %1263 = vpow2.f32 %v878_v7  ;;  %v2187_v38 = vmin.f32 %v229_v27, 14.99  ;;  %v868_v24 = vsub.f32 %v2117_v49, %v2165_v36 }
  0xdf   :  { %1265 = vpow2.f32 %v880_v9  ;;  %v886_v40 = vmul.f32 1.442695, %v866_v23  ;;  %v796_v4 = vmax.f32 %v780_v39, 0.0  ;;  %v810_v50 = vmul.f32 %v794_v32, %v1974_v17 }
  0xe0   :  { %v823_v11 = vadd.f32 %v822_v21, %v808_v1  ;;  %1267 = vpow2.f32 %v882_v30  ;;  %v869_v41 = vsub.f32 %v2119_v37, %v2165_v36  ;;  %v888_v63 = vmul.f32 1.442695, %v867_v52 }
  0xe1   :  { %1269 = vpow2.f32 %v884_v31  ;;  %v811_v45 = vmul.f32 %v795_v8, %v1976_v51  ;;  %v870_v54 = vsub.f32 %v2123_v61, %v2165_v36  ;;  %v890_v44 = vmul.f32 1.442695, %v868_v24  ;;  %v2336_v31 = vld [vmem:[#allocation15_spill] sm:$0xff] }
  0xe2   :  { %v824_v0 = vadd.f32 %v823_v11, %v809_v2  ;;  %1271 = vpow2.f32 %v886_v40  ;;  %v812_v16 = vmul.f32 %v796_v4, %v1978_v53  ;;  %v1119_v17 = vadd.f32 -1.0, %v2187_v38 }
  0xe3   :  { %v871_v22 = vsub.f32 %v2125_v20, %v2165_v36  ;;  %1273 = vpow2.f32 %v888_v63  ;;  %v892_v19 = vmul.f32 1.442695, %v869_v41  ;;  %v1120_v51 = vadd.f32 -2.0, %v2187_v38 }
  0xe4   :  { %v825_v56 = vadd.f32 %v824_v0, %v810_v50  ;;  %v1121_v47 = vadd.f32 -3.0, %v2187_v38  ;;  %v872_v55 = vsub.f32 %v2128_v42, %v2165_v36  ;;  %1275 = vpow2.f32 %v890_v44 }
  0xe5   :  { %v1262_v28 = vpop.eup %1261  ;;  %v894_v53 = vmul.f32 1.442695, %v870_v54  ;;  %v1122_v13 = vadd.f32 -4.0, %v2187_v38  ;;  %v944_v35 = vand.u32 2147483647, %v2187_v38  ;;  %v873_v57 = vsub.f32 %v2130_v48, %v2165_v36 }
  0xe6   :  { %v731_v15 = vmul.f32 0.6931472, %v1262_v28  ;;  %v826_v26 = vadd.f32 %v825_v56, %v811_v45  ;;  %v945_v59 = vand.u32 2147483647, %v1119_v17  ;;  %1277 = vpow2.f32 %v892_v19 }
  0xe7   :  { %v896_v18 = vmul.f32 1.442695, %v871_v22  ;;  %v1123_v39 = vadd.f32 -5.0, %v2187_v38  ;;  %v1124_v46 = vadd.f32 -6.0, %v2187_v38  ;;  %v946_v7 = vand.u32 2147483647, %v1120_v51 }
  0xe8   :  { %v1264_v27 = vpop.eup %1263  ;;  %v732_v12 = vadd.f32 %v731_v15, %v1992_v3  ;;  %v827_v60 = vadd.f32 %v826_v26, %v812_v16  ;;  %v874_v3 = vsub.f32 %v2136_v43, %v2165_v36  ;;  %1279 = vpow2.f32 %v894_v53 }
  0xe9   :  { %v1266_v10 = vpop.eup %1265  ;;  %v898_v52 = vmul.f32 1.442695, %v872_v55  ;;  %v947_v30 = vand.u32 2147483647, %v1121_v47  ;;  %v960_v21 = vsub.f32 1.0, %v944_v35  ;;  %v961_v24 = vsub.f32 1.0, %v945_v59 }
  0xea   :  { %v1268_v32 = vpop.eup %1267  ;;  %v828_v23 = vsub.f32 %v732_v12, %v827_v60  ;;  %v910_v1 = vadd.f32 %v1266_v10, %v1264_v27  ;;  %v875_v4 = vsub.f32 %v2138_v58, %v2165_v36  ;;  %1281 = vpow2.f32 %v896_v18 }
  0xeb   :  { %v1270_v9 = vpop.eup %1269  ;;  %v900_v50 = vmul.f32 1.442695, %v873_v57  ;;  %v1125_v11 = vadd.f32 -7.0, %v2187_v38  ;;  %v1126_v63 = vadd.f32 -8.0, %v2187_v38  ;;  %v948_v45 = vand.u32 2147483647, %v1122_v13 }
  0xec   :  { %v2215_v8 = vadd.f32 %v828_v23, %v2336_v31  ;;  %v911_v2 = vadd.f32 %v1268_v32, %v910_v1  ;;  %v1272_v40 = vpop.eup %1271  ;;  %v962_v0 = vsub.f32 1.0, %v946_v7  ;;  %v876_v44 = vsub.f32 %v2145_v25, %v2165_v36 }
  0xed   :  { %v1274_v54 = vpop.eup %1273  ;;  %1283 = vpow2.f32 %v898_v52  ;;  %v902_v16 = vmul.f32 1.442695, %v874_v3  ;;  %v949_v56 = vand.u32 2147483647, %v1123_v39  ;;  %v963_v28 = vsub.f32 1.0, %v947_v30 }
  0xee   :  { %v912_v41 = vadd.f32 %v1270_v9, %v911_v2  ;;  %v976_v22 = vmax.f32 %v960_v21, 0.0  ;;  %v977_v19 = vmax.f32 %v961_v24, 0.0  ;;  %v1276_v15 = vpop.eup %1275  ;;  %v877_v26 = vsub.f32 %v2147_v33, %v2165_v36 }
  0xef   :  { %1285 = vpow2.f32 %v900_v50  ;;  %v904_v51 = vmul.f32 1.442695, %v875_v4  ;;  %v1127_v47 = vadd.f32 -9.0, %v2187_v38  ;;  %v950_v53 = vand.u32 2147483647, %v1124_v46 }
  0xf0   :  { %v913_v17 = vadd.f32 %v1272_v40, %v912_v41  ;;  %v964_v13 = vsub.f32 1.0, %v948_v45  ;;  %v978_v27 = vmax.f32 %v962_v0, 0.0  ;;  %v1278_v12 = vpop.eup %1277  ;;  %1287 = vpow2.f32 %v902_v16 }
  0xf1   :  { %v906_v60 = vmul.f32 1.442695, %v876_v44  ;;  %v951_v35 = vand.u32 2147483647, %v1125_v11  ;;  %v965_v59 = vsub.f32 1.0, %v949_v56  ;;  %v979_v57 = vmax.f32 %v963_v28, 0.0 }
  0xf2   :  { %v914_v55 = vadd.f32 %v1274_v54, %v913_v17  ;;  %v992_v18 = vmul.f32 %v976_v22, %v2103_v6  ;;  %v993_v39 = vmul.f32 %v977_v19, %v2105_v14  ;;  %v1280_v32 = vpop.eup %1279  ;;  %1289 = vpow2.f32 %v904_v51 }
  0xf3   :  { %v908_v23 = vmul.f32 1.442695, %v877_v26  ;;  %v1128_v1 = vadd.f32 -10.0, %v2187_v38  ;;  %v952_v7 = vand.u32 2147483647, %v1126_v63  ;;  %v966_v9 = vsub.f32 1.0, %v950_v53 }
  0xf4   :  { %v915_v10 = vadd.f32 %v1276_v15, %v914_v55  ;;  %v980_v3 = vmax.f32 %v964_v13, 0.0  ;;  %v994_v52 = vmul.f32 %v978_v27, %v2108_v5  ;;  %v1282_v30 = vpop.eup %1281  ;;  %1291 = vpow2.f32 %v906_v60 }
  0xf5   :  { %v1129_v31 = vadd.f32 -11.0, %v2187_v38  ;;  %v953_v2 = vand.u32 2147483647, %v1127_v47  ;;  %v967_v21 = vsub.f32 1.0, %v951_v35  ;;  %v981_v24 = vmax.f32 %v965_v59, 0.0 }
  0xf6   :  { %v916_v46 = vadd.f32 %v1278_v12, %v915_v10  ;;  %v995_v14 = vmul.f32 %v979_v57, %v2115_v29  ;;  %v1008_v40 = vadd.f32 %v993_v39, %v992_v18  ;;  %1293 = vpow2.f32 %v908_v23 }
  0xf7   :  { %v1284_v4 = vpop.eup %1283  ;;  %v1130_v50 = vadd.f32 -12.0, %v2187_v38  ;;  %v954_v11 = vand.u32 2147483647, %v1128_v1  ;;  %v968_v41 = vsub.f32 1.0, %v952_v7  ;;  %v982_v45 = vmax.f32 %v966_v9, 0.0 }
  0xf8   :  { %v917_v6 = vadd.f32 %v1280_v32, %v916_v46  ;;  %v996_v5 = vmul.f32 %v980_v3, %v2110_v34  ;;  %v1009_v0 = vadd.f32 %v1008_v40, %v994_v52  ;;  %v1131_v44 = vadd.f32 -13.0, %v2187_v38 }
  0xf9   :  { %v1286_v54 = vpop.eup %1285  ;;  %v955_v16 = vand.u32 2147483647, %v1129_v31  ;;  %v969_v56 = vsub.f32 1.0, %v953_v2  ;;  %v983_v28 = vmax.f32 %v967_v21, 0.0  ;;  %v997_v29 = vmul.f32 %v981_v24, %v2112_v62 }
  0xfa   :  { %v918_v63 = vadd.f32 %v1282_v30, %v917_v6  ;;  %v1010_v22 = vadd.f32 %v1009_v0, %v995_v14  ;;  %v1288_v19 = vpop.eup %1287  ;;  %v1132_v15 = vadd.f32 -14.0, %v2187_v38  ;;  %v956_v26 = vand.u32 2147483647, %v1130_v50 }
  0xfb   :  { %v970_v51 = vsub.f32 1.0, %v954_v11  ;;  %v984_v55 = vmax.f32 %v968_v41, 0.0  ;;  %v998_v34 = vmul.f32 %v982_v45, %v2117_v49  ;;  %v1133_v27 = vadd.f32 -15.0, %v2187_v38 }
  0xfc   :  { %v919_v17 = vadd.f32 %v1284_v4, %v918_v63  ;;  %v1011_v53 = vadd.f32 %v1010_v22, %v996_v5  ;;  %v1290_v13 = vpop.eup %1289  ;;  %v957_v12 = vand.u32 2147483647, %v1131_v44  ;;  %v971_v60 = vsub.f32 1.0, %v955_v16 }
  0xfd   :  { %v985_v59 = vmax.f32 %v969_v56, 0.0  ;;  %v999_v62 = vmul.f32 %v983_v28, %v2119_v37  ;;  %v958_v18 = vand.u32 2147483647, %v1132_v15  ;;  %v972_v39 = vsub.f32 1.0, %v956_v26 }
  0xfe   :  { %v920_v47 = vadd.f32 %v1286_v54, %v919_v17  ;;  %v1012_v10 = vadd.f32 %v1011_v53, %v997_v29  ;;  %v1292_v57 = vpop.eup %1291  ;;  %v986_v23 = vmax.f32 %v970_v51, 0.0  ;;  %v1000_v1 = vmul.f32 %v984_v55, %v2123_v61  ;;  %v1299_v29 = vld [vmem:[#allocation2 + $0x50] sm:$0xff] }
  0xff   :  { %v959_v46 = vand.u32 2147483647, %v1133_v27  ;;  %v973_v9 = vsub.f32 1.0, %v957_v12  ;;  %v987_v38 = vmax.f32 %v971_v60, 0.0  ;;  %v1001_v52 = vmul.f32 %v985_v59, %v2125_v20 }
 0x100   :  { %v921_v35 = vadd.f32 %v1288_v19, %v920_v47  ;;  %v1013_v7 = vadd.f32 %v1012_v10, %v998_v34  ;;  %v1294_v49 = vpop.eup %1293  ;;  %v974_v31 = vsub.f32 1.0, %v958_v18  ;;  %v988_v37 = vmax.f32 %v972_v39, 0.0 }
 0x101   :  { %v1002_v21 = vmul.f32 %v986_v23, %v2128_v42  ;;  %v975_v24 = vsub.f32 1.0, %v959_v46  ;;  %v989_v14 = vmax.f32 %v973_v9, 0.0  ;;  %v1003_v61 = vmul.f32 %v987_v38, %v2130_v48 }
 0x102   :  { %v922_v32 = vadd.f32 %v1290_v13, %v921_v35  ;;  %v1014_v30 = vadd.f32 %v1013_v7, %v999_v62  ;;  %v990_v4 = vmax.f32 %v974_v31, 0.0  ;;  %v1004_v50 = vmul.f32 %v988_v37, %v2136_v43 }
 0x103   :  { %v991_v41 = vmax.f32 %v975_v24, 0.0  ;;  %v1005_v20 = vmul.f32 %v989_v14, %v2138_v58 }
 0x104   :  { %v923_v3 = vadd.f32 %v1292_v57, %v922_v32  ;;  %v1015_v6 = vadd.f32 %v1014_v30, %v1000_v1  ;;  %v1006_v45 = vmul.f32 %v990_v4, %v2145_v25 }
 0x105   :  { %v1007_v42 = vmul.f32 %v991_v41, %v2147_v33 }
 0x106   :  { %v924_v2 = vadd.f32 %v1294_v49, %v923_v3  ;;  %v1016_v40 = vadd.f32 %v1015_v6, %v1001_v52 }
 0x108   :  { %1295 = vlog2.f32 %v924_v2  ;;  %v1017_v11 = vadd.f32 %v1016_v40, %v1002_v21 }
 0x10a   :  { %v1018_v63 = vadd.f32 %v1017_v11, %v1003_v61 }
 0x10c   :  { %v1019_v5 = vadd.f32 %v1018_v63, %v1004_v50 }
 0x10e   :  { %v1020_v0 = vadd.f32 %v1019_v5, %v1005_v20 }
 0x110   :  { %v1021_v44 = vadd.f32 %v1020_v0, %v1006_v45 }
 0x112   :  { %v1296_v54 = vpop.eup %1295  ;;  %v1022_v56 = vadd.f32 %v1021_v44, %v1007_v42 }
 0x113   :  { %v926_v16 = vmul.f32 0.6931472, %v1296_v54 }
 0x115   :  { %v927_v48 = vadd.f32 %v926_v16, %v2165_v36 }
 0x117   :  { %v1023_v17 = vsub.f32 %v927_v48, %v1022_v56 }
 0x119   :  { %v1024_v43 = vadd.f32 %v1023_v17, %v2215_v8 }
 0x11b   :  { %v1025_v28 = vmul.f32 0.25, %v1024_v43 }
 0x11d   :  { %v1026_v22 = vmul.f32 %v1299_v29, %v1025_v28 }
 0x11f   :  { %1027 = vadd.xlane.f32.xlu0 %v1026_v22 }
 0x126   :  { %v212_v58 = vpop.xlane.xlu0 %211 }
 0x127   :  { %v213_v19 = vrot.slane %v212_v58, 4 }
 0x129   :  { %v214_v25 = vadd.f32 %v213_v19, %v212_v58 }
 0x12b   :  { %v215_v15 = vrot.slane %v214_v25, 2 }
 0x12d   :  { %v216_v26 = vadd.f32 %v215_v15, %v214_v25 }
 0x12f   :  { %v217_v33 = vrot.slane %v216_v26, 1 }
 0x131   :  { %v218_v51 = vadd.f32 %v217_v33, %v216_v26 }
 0x133   :  { %1036 = vst.msk [vmem:[#allocation7] sm:$0x1] %vm1035_vm11, %v218_v51 }
 0x134   :  { %1355 = shalt.err (!%p1352_p6)
}
 0x135   :  { %s1356_s15 = scalar_lea.hbm %s2278_s2, 16 }
 0x136   :  { %p1357_p7 = scmp.ne.s32.totalorder %s2278_s2, %s1356_s15  ;;  %p1360_p8 = scmp.lt.u32.totalorder %s1356_s15, %s2278_s2 }
 0x138   :  { %p1362_p9 = pnand %p1360_p8, %p1357_p7 }
 0x13a   :  { %1365 = shalt.err (!%p1362_p9)
}
 0x13b   :  { %1047 = dma.vmem_to_hbm [thread:$0]  %s1045_s10, 16, %s2278_s2, [#allocation4]  }
 0x13c   :  { %s1404_s22 = smov [#allocation8]  }
 0x13d   :  { %s1054_s23 = sshll.u32 %s1404_s22, 4  ;;  %s1055_s23 = int_to_ptr.vmem [resolvable:$true] %s1054_s23 }
 0x13e   :  { %s1366_s24 = scalar_lea.vmem %s1055_s23, 16  ;;  %s1370_s25 = scalar_lea.vmem %s1055_s23, 32 }
 0x13f   :  { %p1367_p10 = scmp.ne.s32.totalorder %s1055_s23, %s1366_s24  ;;  %p1371_p11 = scmp.lt.s32.totalorder %s1055_s23, %s1055_s23 }
 0x140   :  { %p1372_p12 = scmp.lt.s32.totalorder %s1370_s25, %s1366_s24 }
 0x142   :  { %p1373_p13 = por %p1372_p12, %p1371_p11 }
 0x144   :  { %p1374_p0 = pnand %p1373_p13, %p1367_p10 }
 0x1ac   :  { %v1028_v36 = vpop.xlane.xlu0 %1027 }
 0x1ad   :  { %v1029_v8 = vrot.slane %v1028_v36, 4 }
 0x1af   :  { %v1030_v47 = vadd.f32 %v1029_v8, %v1028_v36 }
 0x1b1   :  { %v1031_v55 = vrot.slane %v1030_v47, 2 }
 0x1b3   :  { %v1032_v34 = vadd.f32 %v1031_v55, %v1030_v47 }
 0x1b5   :  { %v1033_v53 = vrot.slane %v1032_v34, 1 }
 0x1b7   :  { %v1034_v13 = vadd.f32 %v1033_v53, %v1032_v34 }
 0x1b9   :  { %1037 = vst.msk [vmem:[#allocation8] sm:$0x1] %vm1035_vm11, %v1034_v13 }
 0x1ba   :  { %1377 = shalt.err (!%p1374_p0)
}
 0x1bb   :  { %s1378_s27 = scalar_lea.hbm %s2279_s3, 16 }
 0x1bc   :  { %p1379_p1 = scmp.ne.s32.totalorder %s2279_s3, %s1378_s27  ;;  %p1382_p2 = scmp.lt.u32.totalorder %s1378_s27, %s2279_s3 }
 0x1be   :  { %p1384_p3 = pnand %p1382_p2, %p1379_p1 }
 0x1c0   :  { %1387 = shalt.err (!%p1384_p3)
}
 0x1c1   :  { %1057 = dma.vmem_to_hbm [thread:$0]  %s1055_s23, 16, %s2279_s3, [#allocation9]  }
 0x1c2   :  { %1392 = dma.done.wait [#allocation4], 16  }
 0x1c3   :  { %1393 = vsyncadd [#allocation4], 4294967280 }
 0x1c4   :  { %1394 = dma.done.wait [#allocation9], 16  }
 0x1c5   :  { %1395 = vsyncadd [#allocation9], 4294967280 }
 0x1c6   :  { %1064 = vsyncpa [#allocation3], 1 }
 0x1c7   :  { %1065 = vsyncpa [#allocation6], 1 }
 0x1c8   :  { %1066 = vsyncpa [#allocation4], 1 }
 0x1c9   :  { %1067 = vsyncpa [#allocation9], 1 }

</bundles_post_ra>
